<compile_context>
chip_gen: v7x
topology: tpu7x:2x2x1
jax: 0.10.0
libtpu: 0.0.40
codegen_flags: <defaults>
</compile_context>

<pallas_src>
import math

import jax
import jax.numpy as jnp
from jax.experimental import pallas as pl
from jax.experimental.pallas import tpu as pltpu


# ----------------------------------------------------------------------------
# Kernel: one output tile of  y = x @ W + b   (full K per tile, bf16 operands,
# f32 accumulation, lane-dense (B, 512) stores)
# ----------------------------------------------------------------------------
def _fc1_kernel(x_ref, w_ref, b_ref, o_ref):
    o_ref[...] = (
        jnp.dot(x_ref[...], w_ref[...], preferred_element_type=jnp.float32)
        + b_ref[...]
    )


def my_model_a_forward(params, x, *, tn=512):
    """y = x @ wa + ba  for MyModelA (Linear 2048 -> 1024)."""
    w = params["wa"]          # (K, N) bfloat16
    b2 = params["ba"]         # (1, N) float32, pre-reshaped at init
    B, K = x.shape
    Kw, N = w.shape
    assert K == Kw and N % tn == 0 and N == b2.shape[1]

    x_bf16 = x.astype(jnp.bfloat16)   # halve activation DMA too; f32 accumulate

    return pl.pallas_call(
        _fc1_kernel,
        out_shape=jax.ShapeDtypeStruct((B, N), jnp.float32),
        grid=(N // tn,),
        in_specs=[
            pl.BlockSpec((B, K), lambda j: (0, 0)),    # activations: resident
            pl.BlockSpec((K, tn), lambda j: (0, j)),   # weight column slab
            pl.BlockSpec((1, tn), lambda j: (0, j)),   # bias slice
        ],
        out_specs=pl.BlockSpec((B, tn), lambda j: (0, j)),
        compiler_params=pltpu.CompilerParams(
            dimension_semantics=("parallel",),         # v7x: shard N over 2 TCs
        ),
    )(x_bf16, w, b2)


# ----------------------------------------------------------------------------
# Parameters (deterministic, PyTorch-default-style uniform init)
# ----------------------------------------------------------------------------
def _uniform_init(key, shape, fan_in):
    bound = 1.0 / math.sqrt(fan_in)
    return jax.random.uniform(
        key, shape, dtype=jnp.float32, minval=-bound, maxval=bound
    )


def init_params(key):
    joint_embed = 1024
    k_w, k_b = jax.random.split(key, 2)
    # fc1 = nn.Linear(2048, 1024); stored as (in, out) so y = x @ W + b.
    wa_f32 = _uniform_init(k_w, (2048, joint_embed), 2048)
    ba_f32 = _uniform_init(k_b, (joint_embed,), 2048)
    return {
        "wa": wa_f32.astype(jnp.bfloat16),       # bf16 weight stream from HBM
        "ba": ba_f32.reshape(1, joint_embed),    # pre-reshaped bias, f32
    }


if __name__ == "__main__":
    key = jax.random.PRNGKey(0)
    kp, kx = jax.random.split(key, 2)

    params = init_params(kp)

    B = 8  # small batch, sublane-aligned
    x = jax.random.normal(kx, (B, 2048), dtype=jnp.float32)

    y = my_model_a_forward(params, x)
    jax.block_until_ready(y)

    # Pure-JAX reference of the same math (bf16 operands, f32 accumulation).
    y_ref = (
        jnp.dot(
            x.astype(jnp.bfloat16),
            params["wa"],
            preferred_element_type=jnp.float32,
        )
        + params["ba"]
    )
    assert y.shape == (B, 1024)
    assert y.dtype == jnp.float32
    assert jnp.allclose(y, y_ref, atol=1e-3, rtol=1e-3)

    print("KERNEL_OK")
</pallas_src>

<mosaic_0001>
module attributes {stable_mosaic.version = 11 : i64} {
  func.func @_fc1_kernel(%arg0: i32, %arg1: memref<8x2048xbf16, #tpu.memory_space<vmem>>, %arg2: memref<2048x512xbf16, #tpu.memory_space<vmem>>, %arg3: memref<1x512xf32, #tpu.memory_space<vmem>>, %arg4: memref<8x512xf32, #tpu.memory_space<vmem>>) attributes {dimension_semantics = [#tpu.dimension_semantics<parallel>], iteration_bounds = array<i64: 2>, scalar_prefetch = 0 : i64, scratch_operands = 0 : i64, tpu.core_type = #tpu.core_type<tc>, window_params = [{pipeline_mode = #tpu.pipeline_mode<synchronous>, transform_indices = @transform_0, window_bounds = array<i64: 8, 2048>}, {transform_indices = @transform_1, window_bounds = array<i64: 2048, 512>}, {transform_indices = @transform_2, window_bounds = array<i64: 1, 512>}, {transform_indices = @transform_3, window_bounds = array<i64: 8, 512>}]} {
    %c0 = arith.constant 0 : index
    %c0_0 = arith.constant 0 : index
    %0 = vector.load %arg1[%c0, %c0_0] : memref<8x2048xbf16, #tpu.memory_space<vmem>>, vector<8x2048xbf16>
    %c0_1 = arith.constant 0 : index
    %c0_2 = arith.constant 0 : index
    %1 = vector.load %arg2[%c0_1, %c0_2] : memref<2048x512xbf16, #tpu.memory_space<vmem>>, vector<2048x512xbf16>
    %cst = arith.constant dense<0.000000e+00> : vector<8x512xf32>
    %2 = tpu.matmul %0, %1, %cst {dimension_numbers = #tpu.dot_dimension_numbers<[1], [0], [0], [1], [0, 0, 1, 1], [], []>} : vector<8x2048xbf16>, vector<2048x512xbf16>, vector<8x512xf32> -> vector<8x512xf32>
    %c0_3 = arith.constant 0 : index
    %c0_4 = arith.constant 0 : index
    %3 = vector.load %arg3[%c0_3, %c0_4] : memref<1x512xf32, #tpu.memory_space<vmem>>, vector<1x512xf32>
    %4 = vector.broadcast %3 : vector<1x512xf32> to vector<8x512xf32>
    %5 = arith.addf %2, %4 : vector<8x512xf32>
    %c0_5 = arith.constant 0 : index
    %c0_6 = arith.constant 0 : index
    %6 = vector.load %arg4[%c0_5, %c0_6] : memref<8x512xf32, #tpu.memory_space<vmem>>, vector<8x512xf32>
    tpu.vector_store %arg4[%c0_5, %c0_6], %5 {strides = array<i32>} : memref<8x512xf32, #tpu.memory_space<vmem>>, vector<8x512xf32>,
    return
  }
  func.func @transform_0(%arg0: i32) -> (i32, i32) {
    %c0_i32 = arith.constant 0 : i32
    %c0_i32_0 = arith.constant 0 : i32
    %c0_i32_1 = arith.constant 0 : i32
    return %c0_i32, %c0_i32_0 : i32, i32
  }
  func.func @transform_1(%arg0: i32) -> (i32, i32) {
    %c0_i32 = arith.constant 0 : i32
    %c0_i32_0 = arith.constant 0 : i32
    return %c0_i32, %arg0 : i32, i32
  }
  func.func @transform_2(%arg0: i32) -> (i32, i32) {
    %c0_i32 = arith.constant 0 : i32
    %c0_i32_0 = arith.constant 0 : i32
    return %c0_i32, %arg0 : i32, i32
  }
  func.func @transform_3(%arg0: i32) -> (i32, i32) {
    %c0_i32 = arith.constant 0 : i32
    %c0_i32_0 = arith.constant 0 : i32
    return %c0_i32, %arg0 : i32, i32
  }
}

</mosaic_0001>

<bundles_post_ra>
// kernel: tpu_custom_call.1
= control target key start
LH: loop header
LB: loop body
LE: loop exit
PB: predicated region body
PF: predicated region fallthrough
CT: control target
= control target key end

     0   :  { %8 = vsyncpa [#allocation3], 0  ;;  %s6613_s0 = inlined_call_operand.hbm [shape: bf16[8,2048], index: 0, kind: input, shape index: {}]   ;;  %s6614_s1 = inlined_call_operand.hbm [shape: bf16[2048,1024], index: 1, kind: input, shape index: {}]   ;;  %s6615_s2 = inlined_call_operand.hbm [shape: f32[1,1024], index: 2, kind: input, shape index: {}]   ;;  %s6616_s3 = inlined_call_operand.hbm [shape: f32[8,1024], index: 3, kind: output, shape index: {}]  }
   0x1   :  { %9 = vsyncpa [#allocation6], 0 }
   0x2   :  { %11 = vsyncpa [#allocation6 + $0x1], 0 }
   0x3   :  { %12 = vsyncpa [#allocation4], 0 }
   0x4   :  { %14 = vsyncpa [#allocation4 + $0x1], 0  ;;  %s5822_s12 = smov 0   ;;  %s5824_s13 = smov 0  }
   0x5   :  { %s5826_s14 = smov 0   ;;  %s5828_s15 = smov 0  }
   0x6 LB: > { %s5843_s16 = sadd.s32 1, %s5793_s15   ;;  %s48_s17 = sadd.s32 1, %s5789_s14  ;;  %s5793_s15 = sphi %s5828_s15, %s6643_s15   ;;  %s5789_s14 = sphi %s5826_s14, %s6642_s14   ;;  %s5785_s13 = sphi %s5824_s13, %s6641_s13   ;;  %s5781_s12 = sphi %s5822_s12, %s6640_s12  }
   0x7   : > { %s45_s18 = ssub.s32 %s5793_s15, %s5843_s16  ;;  %p55_p0 = scmp.ne.s32.totalorder %s5789_s14, %s5785_s13 }
   0x8   : > { %p46_p1 = scmp.eq.s32.totalorder %s45_s18, 0  ;;  %p56_p2 = scmp.eq.s32.totalorder %s5793_s15, 0 }
   0x9   : > { %p4812_p4 = scmp.lt.s32.totalorder %s5793_s15, 2  ;;  %s148_s20 = sand.u32 1, %s5793_s15  }
   0xa   : > { %s5854_s19 = scalar_select %p46_p1, %s5789_s14, %s48_s17  }
   0xb   : > { %p57_p5 = por %p56_p2, %p55_p0  ;;  %s150_s21 = sand.u32 1, %s5789_s14  }
   0xc   : > { %s4179_s22 = sshll.u32 %s150_s21, 12  ;;  %s4723_s23 = sshll.u32 %s5793_s15, 8 }
   0xd   : > { %s5867_s26 = scalar_lea.hbm %s6614_s1, %s4723_s23  ;;  %s152_s27 = scalar_lea.vmem [#allocation5], %s4179_s22 }
   0xe   : > { %s159_s28 = sshll.u32 %s152_s27, 4  ;;  %p5869_p6 = pnand %p4812_p4, %p57_p5  ;;  %s5873_s28 = int_to_ptr.vmem [resolvable:$true] %s159_s28 }
   0xf   : > { %s5875_s30 = scalar_lea.sflag [#allocation6], %s148_s20  ;;  %s5635_s4 = scalar_lea.hbm %s5867_s26, 65536 }
  0x10   : > { %s6624_s29 = scalar_select %p5869_p6, 1, 0 }
  0x11   : > { %p5636_p7 = scmp.ne.s32.totalorder %s5867_s26, %s5635_s4  ;;  %p6618_p8 = pneg %p5869_p6 }
  0x12   : > { %s5640_s7 = scalar_lea.hbm %s6614_s1, 131072  ;;  %p5641_p11 = scmp.lt.u32.totalorder %s5867_s26, %s6614_s1 }
  0x13   : > { %p5638_p9 = pnand %p6618_p8, %p5636_p7  ;;  %p5642_p12 = scmp.lt.u32.totalorder %s5640_s7, %s5635_s4 }
  0x14   : > { %p5644_p1 = scmp.lt.u32.totalorder %s5635_s4, %s5867_s26 }
  0x15   : > { %p5639_p10 = pneg %p5638_p9  ;;  %p5643_p13 = por %p5642_p12, %p5641_p11 }
  0x17   : > { %p5645_p2 = por %p5644_p1, %p5643_p13 }
  0x19   : > { %p5646_p4 = pnand %p5645_p2, %p5639_p10 }
  0x1b   : > { %5649 = shalt.err (!%p5646_p4)
}
  0x1c   : > { %s5650_s10 = scalar_lea.vmem %s5873_s28, 65536  ;;  %s5795_s11 = smov [#allocation5]  }
  0x1d   : > { %p5651_p5 = scmp.ne.s32.totalorder %s5873_s28, %s5650_s10  ;;  %s5655_s17 = sshll.u32 %s5795_s11, 4  ;;  %s5656_s17 = int_to_ptr.vmem [resolvable:$false] %s5655_s17 }
  0x1e   : > { %s5657_s18 = scalar_lea.vmem %s5656_s17, 131072  ;;  %p5658_p3 = scmp.lt.s32.totalorder %s5873_s28, %s5656_s17 }
  0x1f   : > { %p5653_p7 = pnand %p5651_p5, %p6618_p8  ;;  %p5659_p11 = scmp.lt.s32.totalorder %s5657_s18, %s5650_s10 }
  0x21   : > { %p5654_p9 = pneg %p5653_p7  ;;  %p5660_p12 = por %p5659_p11, %p5658_p3 }
  0x23   : > { %p5661_p13 = pnand %p5660_p12, %p5654_p9 }
  0x25   : > { %5664 = shalt.err (!%p5661_p13)
}
  0x26   : > { %s5796_s20 = smov 512   ;;  %s5797_s22 = smov 256  }
  0x27   : > { %s5798_s23 = smov 16   ;;  %s5904_s24 = sadd.s32 4294967295, %s5793_s15  }
  0x28   : > { %4803 = dma.hbm_to_vmem [thread:$0]  (!%p5869_p6), %s5867_s26, 65536, %s5873_s28, %s5875_s30, %s5796_s20, %s5797_s22, %s5798_s23  }
  0x29   : > { %s4175_s25 = sadd.s32 4294967294, %s5793_s15   ;;  %p61_p3 = scmp.ne.s32.totalorder %s5785_s13, %s5781_s12 }
  0x2a   : > { %p6617_p10 = scmp.eq.s32.totalorder %s5904_s24, 0  ;;  %p111_p1 = scmp.eq.s32.totalorder %s5904_s24, 1 }
  0x2b   : > { %p117_p2 = scmp.eq.s32.totalorder %s4175_s25, 1  ;;  %p4176_p4 = scmp.ge.s32.totalorder %s5793_s15, 1 }
  0x2c   : > { %p5914_p5 = por %p6617_p10, %p61_p3  ;;  %p5921_p7 = por %p111_p1, %p55_p0 }
  0x2d   : > { %p5925_p9 = por %p117_p2, %p61_p3  ;;  %p124_p11 = scmp.lt.s32.totalorder %s5793_s15, 3 }
  0x2e   : > { %s6625_s27 = scalar_select %p5914_p5, 1, 0 }
  0x2f   : > { %s6626_s26 = scalar_select %p5921_p7, 1, 0 }
  0x30   : > { %s6627_s28 = scalar_select %p5925_p9, 1, 0 }
  0x31   : > { %p5930_p12 = pnand %p4176_p4, %p124_p11  ;;  %s5799_s5 = smov [#allocation2]  }
  0x32   : > { %s137_s6 = sshll.u32 %s5799_s5, 4  ;;  %s4182_s7 = sshll.u32 %s150_s21, 2  ;;  %s138_s6 = int_to_ptr.vmem [resolvable:$true] %s137_s6 }
  0x33   : > { %s6628_s4 = scalar_select %p5930_p12, 1, 0 }
  0x34   : > { %p4796_p13 = pneg %p5930_p12  ;;  %s4724_s8 = sshll.u32 %s5793_s15, 6 }
  0x35   : > { %s173_s9 = scalar_lea.vmem [#allocation7], %s4182_s7  ;;  %s5948_s20 = scalar_lea.hbm %s6615_s2, %s4724_s8 }
  0x36   : > { %s181_s10 = sshll.u32 %s173_s9, 4  ;;  %p5941_p0 = pnand %p4796_p13, %p6617_p10  ;;  %s5950_s10 = int_to_ptr.vmem [resolvable:$true] %s181_s10 }
  0x37   : > { %s5665_s23 = scalar_lea.hbm %s6613_s0, 1024 }
  0x38   : > { %p5666_p3 = scmp.ne.s32.totalorder %s6613_s0, %s5665_s23  ;;  %p5667_p1 = pneg %p5941_p0 }
  0x39   : > { %p5672_p11 = scmp.lt.u32.totalorder %s5665_s23, %s6613_s0 }
  0x3a   : > { %p5668_p2 = pnand %p5667_p1, %p5666_p3 }
  0x3c   : > { %p5669_p4 = pneg %p5668_p2 }
  0x3e   : > { %p5674_p13 = pnand %p5672_p11, %p5669_p4 }
  0x40   : > { %5677 = shalt.err (!%p5674_p13)
}
  0x41   : > { %s5678_s8 = scalar_lea.vmem %s138_s6, 1024  ;;  %p5686_p7 = scmp.lt.s32.totalorder %s138_s6, %s138_s6 }
  0x42   : > { %p5679_p10 = scmp.ne.s32.totalorder %s138_s6, %s5678_s8  ;;  %p5687_p5 = scmp.lt.s32.totalorder %s5678_s8, %s5678_s8 }
  0x44   : > { %p5681_p8 = pnand %p5679_p10, %p5667_p1  ;;  %p5688_p12 = por %p5687_p5, %p5686_p7 }
  0x46   : > { %p5682_p9 = pneg %p5681_p8 }
  0x48   : > { %p5689_p6 = pnand %p5688_p12, %p5682_p9 }
  0x4a   : > { %5692 = shalt.err (!%p5689_p6)
}
  0x4b   : > { %4799 = dma.hbm_to_vmem [thread:$0]  (!%p5941_p0), %s6613_s0, 1024, %s138_s6, [#allocation3]  }
  0x4c   : > { %s5693_s21 = scalar_lea.hbm %s5948_s20, 64  ;;  %p6630_p10 = scmp.ne.s32.totalorder %s6624_s29, 0 }
  0x4d   : > { %p5694_p3 = scmp.ne.s32.totalorder %s5948_s20, %s5693_s21  ;;  %s5698_s25 = scalar_lea.hbm %s6615_s2, 128 }
  0x4e   : > { %p6631_p8 = pneg %p6630_p10  ;;  %p5699_p6 = scmp.lt.u32.totalorder %s5948_s20, %s6615_s2 }
  0x4f   : > { %p5700_p5 = scmp.lt.u32.totalorder %s5698_s25, %s5693_s21  ;;  %p5702_p9 = scmp.lt.u32.totalorder %s5693_s21, %s5948_s20 }
  0x50   : > { %p5696_p1 = pnand %p5694_p3, %p6631_p8 }
  0x51   : > { %p5701_p7 = por %p5700_p5, %p5699_p6 }
  0x52   : > { %p5697_p2 = pneg %p5696_p1 }
  0x53   : > { %p5703_p12 = por %p5702_p9, %p5701_p7 }
  0x55   : > { %p5704_p4 = pnand %p5703_p12, %p5697_p2 }
  0x57   : > { %5707 = shalt.err (!%p5704_p4)
}
  0x58   : > { %s5708_s6 = scalar_lea.vmem %s5950_s10, 64  ;;  %p6632_p11 = pmov %p6631_p8 }
  0x59   : > { %p5709_p0 = scmp.ne.s32.totalorder %s5950_s10, %s5708_s6  ;;  %s5800_s7 = smov [#allocation7]  }
  0x5a   : > { %s5713_s9 = sshll.u32 %s5800_s7, 4  ;;  %s5714_s9 = int_to_ptr.vmem [resolvable:$false] %s5713_s9 }
  0x5b   : > { %p5711_p13 = pnand %p5709_p0, %p6632_p11  ;;  %s5715_s8 = scalar_lea.vmem %s5714_s9, 128 }
  0x5c   : > { %p5716_p8 = scmp.lt.s32.totalorder %s5950_s10, %s5714_s9  ;;  %p5717_p1 = scmp.lt.s32.totalorder %s5715_s8, %s5708_s6 }
  0x5d   : > { %p5712_p3 = pneg %p5711_p13 }
  0x5e   : > { %p5718_p6 = por %p5717_p1, %p5716_p8 }
  0x60   : > { %p5719_p5 = pnand %p5718_p6, %p5712_p3 }
  0x62   : > { %5722 = shalt.err (!%p5719_p5)
}
  0x63   : > { %4806 = dma.hbm_to_vmem [thread:$0]  (!%p6630_p10), %s5948_s20, 64, %s5950_s10, %s5875_s30  }
  0x64   : > { %p6633_p2 = scmp.ne.s32.totalorder %s6628_s4, 0 }
  0x65   : > { %p6634_p7 = scmp.eq.s32.totalorder (!%p6633_p2), %s5904_s24, 0 }
  0x66   : > { %190 = sbr.rel (%p6633_p2) target bundleno = 857 (0x359), region = 32 }
  0x6d   : > { %5768 = dma.done.wait (%p6634_p7), [#allocation3], 1024   ;;  %p6635_p9 = pmov %p6634_p7 }
  0x6e   : > { %s196_s17 = sand.u32 1, %s5904_s24   ;;  %s6000_s18 = sand.u32 1, %s5785_s13  }
  0x6f   : > { %5770 = vsyncadd (%p6635_p9), [#allocation3], 4294966272  ;;  %s4187_s29 = sshll.u32 %s6000_s18, 12  ;;  %s197_s21 = scalar_lea.sflag [#allocation6], %s196_s17 }
  0x70   : > { %s6003_s22 = scalar_lea.vmem [#allocation5], %s4187_s29  ;;  %p6636_p10 = scmp.ne.s32.totalorder %s6625_s27, 0 }
  0x72   : > { %5772 = dma.done.wait (%p6636_p10), %s197_s21, 65600  }
  0x73   : > { %5774 = vsyncadd (%p6636_p10), %s197_s21, 4294901696  ;;  %v4851_v0 = vld [vmem:[%s6003_s22 + $0x4] ss:$16 sps:$4 sm:$0xff]   ;;  %v4853_v1 = vld [vmem:[%s6003_s22 + $0xc] ss:$16 sps:$4 sm:$0xff]   ;;  %s4188_s30 = sshll.u32 %s6000_s18, 2 }
  0x74   : > { %3398 = vmatprep.subr.bf16.mxu0 %v4851_v0  ;;  %v4855_v2 = vld [vmem:[%s6003_s22] ss:$16 sps:$4 sm:$0xff]   ;;  %v4856_v3 = vld [vmem:[%s6003_s22 + $0x8] ss:$16 sps:$4 sm:$0xff]   ;;  %3726 = vmatprep.subr.bf16.mxu1 %v4853_v1  ;;  %v4857_v4 = vld [vmem:[%s6003_s22 + $0x24] ss:$16 sps:$4 sm:$0xff]  }
  0x75   : > { %3399 = vmatpush1.bf16.msra.mxu0 %v4855_v2  ;;  %3727 = vmatpush1.bf16.msra.mxu1 %v4856_v3  ;;  %v4859_v5 = vld [vmem:[%s6003_s22 + $0x2c] ss:$16 sps:$4 sm:$0xff]   ;;  %v4861_v6 = vld [vmem:[%s6003_s22 + $0x20] ss:$16 sps:$4 sm:$0xff]   ;;  %v4862_v7 = vld [vmem:[%s6003_s22 + $0x28] ss:$16 sps:$4 sm:$0xff]  }
  0x76   : > { %3400 = vmatprep.subr.bf16.mxu0 %v4857_v4  ;;  %3728 = vmatprep.subr.bf16.mxu1 %v4859_v5  ;;  %v4863_v8 = vld [vmem:[%s6003_s22 + $0x44] ss:$16 sps:$4 sm:$0xff]   ;;  %v4865_v9 = vld [vmem:[%s6003_s22 + $0x4c] ss:$16 sps:$4 sm:$0xff]   ;;  %v4867_v10 = vld [vmem:[%s6003_s22 + $0x40] ss:$16 sps:$4 sm:$0xff]  }
  0x77   : > { %v4868_v11 = vld [vmem:[%s6003_s22 + $0x48] ss:$16 sps:$4 sm:$0xff]   ;;  %v4869_v12 = vld [vmem:[%s6003_s22 + $0x64] ss:$16 sps:$4 sm:$0xff]   ;;  %v4871_v13 = vld [vmem:[%s6003_s22 + $0x6c] ss:$16 sps:$4 sm:$0xff]  }
  0x78   : > { %v4873_v14 = vld [vmem:[%s6003_s22 + $0x60] ss:$16 sps:$4 sm:$0xff]   ;;  %v4874_v15 = vld [vmem:[%s6003_s22 + $0x68] ss:$16 sps:$4 sm:$0xff]   ;;  %v4875_v16 = vld [vmem:[%s6003_s22 + $0x84] ss:$16 sps:$4 sm:$0xff]  }
  0x79   : > { %3401 = vmatpush1.bf16.msra.mxu0 %v4861_v6  ;;  %3729 = vmatpush1.bf16.msra.mxu1 %v4862_v7  ;;  %v4877_v17 = vld [vmem:[%s6003_s22 + $0x8c] ss:$16 sps:$4 sm:$0xff]   ;;  %v4879_v18 = vld [vmem:[%s6003_s22 + $0x80] ss:$16 sps:$4 sm:$0xff]   ;;  %v4880_v19 = vld [vmem:[%s6003_s22 + $0x88] ss:$16 sps:$4 sm:$0xff]  }
  0x7a   : > { %3402 = vmatprep.subr.bf16.mxu0 %v4863_v8  ;;  %3730 = vmatprep.subr.bf16.mxu1 %v4865_v9  ;;  %v4881_v20 = vld [vmem:[%s6003_s22 + $0xa4] ss:$16 sps:$4 sm:$0xff]   ;;  %v4883_v21 = vld [vmem:[%s6003_s22 + $0xac] ss:$16 sps:$4 sm:$0xff]   ;;  %v4885_v22 = vld [vmem:[%s6003_s22 + $0xa0] ss:$16 sps:$4 sm:$0xff]  }
  0x7b   : > { %v4886_v23 = vld [vmem:[%s6003_s22 + $0xa8] ss:$16 sps:$4 sm:$0xff]   ;;  %v4887_v24 = vld [vmem:[%s6003_s22 + $0xc4] ss:$16 sps:$4 sm:$0xff]   ;;  %v4889_v25 = vld [vmem:[%s6003_s22 + $0xcc] ss:$16 sps:$4 sm:$0xff]  }
  0x7c   : > { %v4891_v26 = vld [vmem:[%s6003_s22 + $0xc0] ss:$16 sps:$4 sm:$0xff]   ;;  %v4892_v27 = vld [vmem:[%s6003_s22 + $0xc8] ss:$16 sps:$4 sm:$0xff]   ;;  %v4893_v28 = vld [vmem:[%s6003_s22 + $0xe4] ss:$16 sps:$4 sm:$0xff]  }
  0x7d   : > { %3403 = vmatpush1.bf16.msra.mxu0 %v4867_v10  ;;  %3731 = vmatpush1.bf16.msra.mxu1 %v4868_v11  ;;  %v4895_v29 = vld [vmem:[%s6003_s22 + $0xec] ss:$16 sps:$4 sm:$0xff]   ;;  %v4897_v30 = vld [vmem:[%s6003_s22 + $0xe0] ss:$16 sps:$4 sm:$0xff]   ;;  %v4898_v31 = vld [vmem:[%s6003_s22 + $0xe8] ss:$16 sps:$4 sm:$0xff]  }
  0x7e   : > { %3404 = vmatprep.subr.bf16.mxu0 %v4869_v12  ;;  %3732 = vmatprep.subr.bf16.mxu1 %v4871_v13  ;;  %v4899_v32 = vld [vmem:[%s6003_s22 + $0x104] ss:$16 sps:$4 sm:$0xff]   ;;  %v4901_v33 = vld [vmem:[%s6003_s22 + $0x10c] ss:$16 sps:$4 sm:$0xff]   ;;  %v4903_v34 = vld [vmem:[%s6003_s22 + $0x100] ss:$16 sps:$4 sm:$0xff]  }
  0x7f   : > { %v4904_v35 = vld [vmem:[%s6003_s22 + $0x108] ss:$16 sps:$4 sm:$0xff]   ;;  %v4905_v36 = vld [vmem:[%s6003_s22 + $0x124] ss:$16 sps:$4 sm:$0xff]   ;;  %v4907_v37 = vld [vmem:[%s6003_s22 + $0x12c] ss:$16 sps:$4 sm:$0xff]  }
  0x80   : > { %v4909_v38 = vld [vmem:[%s6003_s22 + $0x120] ss:$16 sps:$4 sm:$0xff]   ;;  %v4910_v39 = vld [vmem:[%s6003_s22 + $0x128] ss:$16 sps:$4 sm:$0xff]   ;;  %v4911_v40 = vld [vmem:[%s6003_s22 + $0x144] ss:$16 sps:$4 sm:$0xff]  }
  0x81   : > { %3405 = vmatpush1.bf16.msra.mxu0 %v4873_v14  ;;  %3733 = vmatpush1.bf16.msra.mxu1 %v4874_v15  ;;  %v4913_v41 = vld [vmem:[%s6003_s22 + $0x14c] ss:$16 sps:$4 sm:$0xff]   ;;  %v4915_v42 = vld [vmem:[%s6003_s22 + $0x140] ss:$16 sps:$4 sm:$0xff]   ;;  %v4916_v43 = vld [vmem:[%s6003_s22 + $0x148] ss:$16 sps:$4 sm:$0xff]  }
  0x82   : > { %3406 = vmatprep.subr.bf16.mxu0 %v4875_v16  ;;  %3734 = vmatprep.subr.bf16.mxu1 %v4877_v17  ;;  %v4917_v44 = vld [vmem:[%s6003_s22 + $0x164] ss:$16 sps:$4 sm:$0xff]   ;;  %v4919_v45 = vld [vmem:[%s6003_s22 + $0x16c] ss:$16 sps:$4 sm:$0xff]   ;;  %v4921_v47 = vld [vmem:[%s6003_s22 + $0x160] ss:$16 sps:$4 sm:$0xff]  }
  0x83   : > { %v240_v46 = vld [vmem:[#allocation2] sm:$0xff]  ;;  %v4922_v49 = vld [vmem:[%s6003_s22 + $0x168] ss:$16 sps:$4 sm:$0xff]   ;;  %v4925_v51 = vld [vmem:[%s6003_s22 + $0x18c] ss:$16 sps:$4 sm:$0xff]   ;;  %s4189_s27 = sshll.u32 %s6000_s18, 5 }
  0x84   : > { %v4191_v48 = vcombine.high %v240_v46, %v240_v46  ;;  %v4923_v50 = vld [vmem:[%s6003_s22 + $0x184] ss:$16 sps:$4 sm:$0xff]   ;;  %v4927_v52 = vld [vmem:[%s6003_s22 + $0x180] ss:$16 sps:$4 sm:$0xff]   ;;  %v4928_v53 = vld [vmem:[%s6003_s22 + $0x188] ss:$16 sps:$4 sm:$0xff]   ;;  %v4190_v4 = vcombine.low %v240_v46, %v240_v46 }
  0x85   : > { %3407 = vmatpush1.bf16.msra.mxu0 %v4879_v18  ;;  %3735 = vmatpush1.bf16.msra.mxu1 %v4880_v19  ;;  %v4929_v54 = vld [vmem:[%s6003_s22 + $0x1a4] ss:$16 sps:$4 sm:$0xff]   ;;  %v4931_v55 = vld [vmem:[%s6003_s22 + $0x1ac] ss:$16 sps:$4 sm:$0xff]   ;;  %v4933_v56 = vld [vmem:[%s6003_s22 + $0x1a0] ss:$16 sps:$4 sm:$0xff]  }
  0x86   : > { %3408 = vmatprep.subr.bf16.mxu0 %v4881_v20  ;;  %3736 = vmatprep.subr.bf16.mxu1 %v4883_v21  ;;  %v4934_v57 = vld [vmem:[%s6003_s22 + $0x1a8] ss:$16 sps:$4 sm:$0xff]   ;;  %v4935_v58 = vld [vmem:[%s6003_s22 + $0x1c4] ss:$16 sps:$4 sm:$0xff]   ;;  %v4937_v59 = vld [vmem:[%s6003_s22 + $0x1cc] ss:$16 sps:$4 sm:$0xff]  }
  0x87   : > { %3430 = vmatprep.mubr.bf16.mxu0 %v4191_v48  ;;  %3758 = vmatprep.mubr.bf16.mxu1 %v4191_v48  ;;  %v4939_v60 = vld [vmem:[%s6003_s22 + $0x1c0] ss:$16 sps:$4 sm:$0xff]   ;;  %v4940_v61 = vld [vmem:[%s6003_s22 + $0x1c8] ss:$16 sps:$4 sm:$0xff]   ;;  %v4941_v62 = vld [vmem:[%s6003_s22 + $0x1e4] ss:$16 sps:$4 sm:$0xff]  }
  0x88   : > { %v4943_v63 = vld [vmem:[%s6003_s22 + $0x1ec] ss:$16 sps:$4 sm:$0xff]   ;;  %v4945_v0 = vld [vmem:[%s6003_s22 + $0x1e0] ss:$16 sps:$4 sm:$0xff]   ;;  %v4946_v1 = vld [vmem:[%s6003_s22 + $0x1e8] ss:$16 sps:$4 sm:$0xff]  }
  0x89   : > { %3409 = vmatpush1.bf16.msra.mxu0 %v4885_v22  ;;  %3737 = vmatpush1.bf16.msra.mxu1 %v4886_v23  ;;  %v4951_v2 = vld [vmem:[%s6003_s22 + $0x204] ss:$16 sps:$4 sm:$0xff]   ;;  %v4954_v3 = vld [vmem:[%s6003_s22 + $0x20c] ss:$16 sps:$4 sm:$0xff]   ;;  %v4949_v5 = vld [vmem:[%s6003_s22 + $0x200] ss:$16 sps:$4 sm:$0xff]  }
  0x8a   : > { %3410 = vmatprep.subr.bf16.mxu0 %v4887_v24  ;;  %3738 = vmatprep.subr.bf16.mxu1 %v4889_v25  ;;  %v4952_v6 = vld [vmem:[%s6003_s22 + $0x208] ss:$16 sps:$4 sm:$0xff]   ;;  %v4957_v7 = vld [vmem:[%s6003_s22 + $0x224] ss:$16 sps:$4 sm:$0xff]   ;;  %v4960_v8 = vld [vmem:[%s6003_s22 + $0x22c] ss:$16 sps:$4 sm:$0xff]  }
  0x8b   : > { %v4955_v9 = vld [vmem:[%s6003_s22 + $0x220] ss:$16 sps:$4 sm:$0xff]   ;;  %v4958_v10 = vld [vmem:[%s6003_s22 + $0x228] ss:$16 sps:$4 sm:$0xff]   ;;  %v4963_v11 = vld [vmem:[%s6003_s22 + $0x244] ss:$16 sps:$4 sm:$0xff]  }
  0x8c   : > { %v4966_v12 = vld [vmem:[%s6003_s22 + $0x24c] ss:$16 sps:$4 sm:$0xff]   ;;  %v4961_v13 = vld [vmem:[%s6003_s22 + $0x240] ss:$16 sps:$4 sm:$0xff]   ;;  %v4964_v14 = vld [vmem:[%s6003_s22 + $0x248] ss:$16 sps:$4 sm:$0xff]  }
  0x8d   : > { %3411 = vmatpush1.bf16.msra.mxu0 %v4891_v26  ;;  %3739 = vmatpush1.bf16.msra.mxu1 %v4892_v27  ;;  %v4969_v15 = vld [vmem:[%s6003_s22 + $0x264] ss:$16 sps:$4 sm:$0xff]   ;;  %v4972_v16 = vld [vmem:[%s6003_s22 + $0x26c] ss:$16 sps:$4 sm:$0xff]   ;;  %v4967_v17 = vld [vmem:[%s6003_s22 + $0x260] ss:$16 sps:$4 sm:$0xff]  }
  0x8e   : > { %3412 = vmatprep.subr.bf16.mxu0 %v4893_v28  ;;  %3740 = vmatprep.subr.bf16.mxu1 %v4895_v29  ;;  %v4970_v18 = vld [vmem:[%s6003_s22 + $0x268] ss:$16 sps:$4 sm:$0xff]   ;;  %v4975_v19 = vld [vmem:[%s6003_s22 + $0x284] ss:$16 sps:$4 sm:$0xff]   ;;  %v4978_v20 = vld [vmem:[%s6003_s22 + $0x28c] ss:$16 sps:$4 sm:$0xff]  }
  0x8f   : > { %v4973_v21 = vld [vmem:[%s6003_s22 + $0x280] ss:$16 sps:$4 sm:$0xff]   ;;  %v4976_v22 = vld [vmem:[%s6003_s22 + $0x288] ss:$16 sps:$4 sm:$0xff]   ;;  %v4981_v23 = vld [vmem:[%s6003_s22 + $0x2a4] ss:$16 sps:$4 sm:$0xff]  }
  0x90   : > { %v4984_v24 = vld [vmem:[%s6003_s22 + $0x2ac] ss:$16 sps:$4 sm:$0xff]   ;;  %v4979_v25 = vld [vmem:[%s6003_s22 + $0x2a0] ss:$16 sps:$4 sm:$0xff]   ;;  %v4982_v26 = vld [vmem:[%s6003_s22 + $0x2a8] ss:$16 sps:$4 sm:$0xff]  }
  0x91   : > { %3413 = vmatpush1.bf16.msra.mxu0 %v4897_v30  ;;  %3741 = vmatpush1.bf16.msra.mxu1 %v4898_v31  ;;  %v4987_v27 = vld [vmem:[%s6003_s22 + $0x2c4] ss:$16 sps:$4 sm:$0xff]   ;;  %v4990_v28 = vld [vmem:[%s6003_s22 + $0x2cc] ss:$16 sps:$4 sm:$0xff]   ;;  %v4985_v31 = vld [vmem:[%s6003_s22 + $0x2c0] ss:$16 sps:$4 sm:$0xff]  }
  0x92   : > { %3414 = vmatprep.subr.bf16.mxu0 %v4899_v32  ;;  %3742 = vmatprep.subr.bf16.mxu1 %v4901_v33  ;;  %v6099_v29 = vld [vmem:[#allocation2 + $0x8] sm:$0xff]  ;;  %v4993_v33 = vld [vmem:[%s6003_s22 + $0x2e4] ss:$16 sps:$4 sm:$0xff]   ;;  %s209_s4 = scalar_lea.vmem [#allocation7], %s4188_s30  ;;  %s4725_s10 = sshll.u32 %s5904_s24, 9 }
  0x93   : > { %v4193_v30 = vcombine.high %v6099_v29, %v6099_v29  ;;  %v4988_v32 = vld [vmem:[%s6003_s22 + $0x2c8] ss:$16 sps:$4 sm:$0xff]   ;;  %v5014_v46 = vld [vmem:[%s6003_s22 + $0x34c] ss:$16 sps:$4 sm:$0xff]   ;;  %s236_s20 = scalar_lea.vmem [#allocation8], %s4189_s27  ;;  %s6569_s5 = scalar_lea.hbm %s6616_s3, %s4725_s10 }
  0x94   : > { %v5012_v48 = vld [vmem:[%s6003_s22 + $0x348] ss:$16 sps:$4 sm:$0xff]   ;;  %s4073_s23 = sshll.u32 %s236_s20, 4  ;;  %s4059_s24 = scalar_lea.sflag [#allocation4], %s6000_s18  ;;  %s6571_s23 = int_to_ptr.vmem [resolvable:$true] %s4073_s23 }
  0x95   : > { %3415 = vmatpush1.bf16.msra.mxu0 %v4903_v34  ;;  %3743 = vmatpush1.bf16.msra.mxu1 %v4904_v35  ;;  %v4996_v34 = vld [vmem:[%s6003_s22 + $0x2ec] ss:$16 sps:$4 sm:$0xff]   ;;  %v4991_v35 = vld [vmem:[%s6003_s22 + $0x2e0] ss:$16 sps:$4 sm:$0xff]   ;;  %s5723_s6 = scalar_lea.vmem %s6571_s23, 512  ;;  %p6637_p4 = scmp.ne.s32.totalorder %s6626_s26, 0 }
  0x96   : > { %3416 = vmatprep.subr.bf16.mxu0 %v4905_v36  ;;  %3744 = vmatprep.subr.bf16.mxu1 %v4907_v37  ;;  %v4994_v36 = vld [vmem:[%s6003_s22 + $0x2e8] ss:$16 sps:$4 sm:$0xff]   ;;  %v4999_v37 = vld [vmem:[%s6003_s22 + $0x304] ss:$16 sps:$4 sm:$0xff]   ;;  %p5724_p12 = scmp.ne.s32.totalorder %s6571_s23, %s5723_s6  ;;  %s5801_s7 = smov [#allocation8]  }
  0x97   : > { %s5727_s9 = sshll.u32 %s5801_s7, 4  ;;  %s5728_s9 = int_to_ptr.vmem [resolvable:$false] %s5727_s9 }
  0x98   : > { %p5725_p0 = pnand %p5724_p12, %p6637_p4  ;;  %s5729_s8 = scalar_lea.vmem %s5728_s9, 1024 }
  0x99   : > { %3417 = vmatpush1.bf16.msra.mxu0 %v4909_v38  ;;  %3745 = vmatpush1.bf16.msra.mxu1 %v4910_v39  ;;  %v5002_v38 = vld [vmem:[%s6003_s22 + $0x30c] ss:$16 sps:$4 sm:$0xff]   ;;  %v4997_v39 = vld [vmem:[%s6003_s22 + $0x300] ss:$16 sps:$4 sm:$0xff]   ;;  %p5730_p13 = scmp.lt.s32.totalorder %s6571_s23, %s5728_s9  ;;  %p5731_p3 = scmp.lt.s32.totalorder %s5729_s8, %s5723_s6 }
  0x9a   : > { %3418 = vmatprep.subr.bf16.mxu0 %v4911_v40  ;;  %3746 = vmatprep.subr.bf16.mxu1 %v4913_v41  ;;  %v5000_v40 = vld [vmem:[%s6003_s22 + $0x308] ss:$16 sps:$4 sm:$0xff]   ;;  %v5005_v41 = vld [vmem:[%s6003_s22 + $0x324] ss:$16 sps:$4 sm:$0xff]   ;;  %p5726_p11 = pneg %p5725_p0 }
  0x9b   : > { %p5732_p8 = por %p5731_p3, %p5730_p13 }
  0x9d   : > { %3419 = vmatpush1.bf16.msra.mxu0 %v4915_v42  ;;  %3747 = vmatpush1.bf16.msra.mxu1 %v4916_v43  ;;  %v5008_v42 = vld [vmem:[%s6003_s22 + $0x32c] ss:$16 sps:$4 sm:$0xff]   ;;  %v5003_v43 = vld [vmem:[%s6003_s22 + $0x320] ss:$16 sps:$4 sm:$0xff]   ;;  %p5733_p1 = pnand %p5732_p8, %p5726_p11 }
  0x9e   : > { %3420 = vmatprep.subr.bf16.mxu0 %v4917_v44  ;;  %3748 = vmatprep.subr.bf16.mxu1 %v4919_v45  ;;  %v5006_v44 = vld [vmem:[%s6003_s22 + $0x328] ss:$16 sps:$4 sm:$0xff]   ;;  %v5011_v45 = vld [vmem:[%s6003_s22 + $0x344] ss:$16 sps:$4 sm:$0xff]  }
  0xa1   : > { %3421 = vmatpush1.bf16.msra.mxu0 %v4921_v47  ;;  %3749 = vmatpush1.bf16.msra.mxu1 %v4922_v49  ;;  %v5009_v47 = vld [vmem:[%s6003_s22 + $0x340] ss:$16 sps:$4 sm:$0xff]   ;;  %v5017_v49 = vld [vmem:[%s6003_s22 + $0x364] ss:$16 sps:$4 sm:$0xff]  }
  0xa2   : > { %3422 = vmatprep.subr.bf16.mxu0 %v4923_v50  ;;  %3750 = vmatprep.subr.bf16.mxu1 %v4925_v51  ;;  %v5020_v50 = vld [vmem:[%s6003_s22 + $0x36c] ss:$16 sps:$4 sm:$0xff]   ;;  %v5015_v51 = vld [vmem:[%s6003_s22 + $0x360] ss:$16 sps:$4 sm:$0xff]  }
  0xa5   : > { %3423 = vmatpush1.bf16.msra.mxu0 %v4927_v52  ;;  %3751 = vmatpush1.bf16.msra.mxu1 %v4928_v53  ;;  %v5018_v52 = vld [vmem:[%s6003_s22 + $0x368] ss:$16 sps:$4 sm:$0xff]   ;;  %v5023_v53 = vld [vmem:[%s6003_s22 + $0x384] ss:$16 sps:$4 sm:$0xff]  }
  0xa6   : > { %3424 = vmatprep.subr.bf16.mxu0 %v4929_v54  ;;  %3752 = vmatprep.subr.bf16.mxu1 %v4931_v55  ;;  %v5026_v54 = vld [vmem:[%s6003_s22 + $0x38c] ss:$16 sps:$4 sm:$0xff]   ;;  %v5021_v55 = vld [vmem:[%s6003_s22 + $0x380] ss:$16 sps:$4 sm:$0xff]  }
  0xa9   : > { %3425 = vmatpush1.bf16.msra.mxu0 %v4933_v56  ;;  %3753 = vmatpush1.bf16.msra.mxu1 %v4934_v57  ;;  %v5024_v56 = vld [vmem:[%s6003_s22 + $0x388] ss:$16 sps:$4 sm:$0xff]   ;;  %v5029_v57 = vld [vmem:[%s6003_s22 + $0x3a4] ss:$16 sps:$4 sm:$0xff]  }
  0xaa   : > { %3426 = vmatprep.subr.bf16.mxu0 %v4935_v58  ;;  %3754 = vmatprep.subr.bf16.mxu1 %v4937_v59  ;;  %v5032_v58 = vld [vmem:[%s6003_s22 + $0x3ac] ss:$16 sps:$4 sm:$0xff]   ;;  %v5027_v59 = vld [vmem:[%s6003_s22 + $0x3a0] ss:$16 sps:$4 sm:$0xff]  }
  0xad   : > { %3427 = vmatpush1.bf16.msra.mxu0 %v4939_v60  ;;  %3755 = vmatpush1.bf16.msra.mxu1 %v4940_v61  ;;  %v5030_v60 = vld [vmem:[%s6003_s22 + $0x3a8] ss:$16 sps:$4 sm:$0xff]   ;;  %v5035_v61 = vld [vmem:[%s6003_s22 + $0x3c4] ss:$16 sps:$4 sm:$0xff]  }
  0xae   : > { %3428 = vmatprep.subr.bf16.mxu0 %v4941_v62  ;;  %3756 = vmatprep.subr.bf16.mxu1 %v4943_v63  ;;  %v5038_v62 = vld [vmem:[%s6003_s22 + $0x3cc] ss:$16 sps:$4 sm:$0xff]   ;;  %v5033_v63 = vld [vmem:[%s6003_s22 + $0x3c0] ss:$16 sps:$4 sm:$0xff]  }
  0xb1   : > { %3429 = vmatpush1.bf16.msra.mxu0 %v4945_v0  ;;  %3757 = vmatpush1.bf16.msra.mxu1 %v4946_v1  ;;  %v5036_v0 = vld [vmem:[%s6003_s22 + $0x3c8] ss:$16 sps:$4 sm:$0xff]   ;;  %v5041_v1 = vld [vmem:[%s6003_s22 + $0x3e4] ss:$16 sps:$4 sm:$0xff]  }
  0xb2   : > { %3439 = vmatprep.subr.bf16.mxu0 %v4951_v2  ;;  %3767 = vmatprep.subr.bf16.mxu1 %v4954_v3  ;;  %v5044_v2 = vld [vmem:[%s6003_s22 + $0x3ec] ss:$16 sps:$4 sm:$0xff]   ;;  %v5039_v3 = vld [vmem:[%s6003_s22 + $0x3e0] ss:$16 sps:$4 sm:$0xff]  }
  0xb4   : > { %3431 = vmatmul.mubr.bf16.vlgmr.msra.gmra.mrb[0].mxu0 %v4190_v4  ;;  %3759 = vmatmul.mubr.bf16.vlgmr.msra.gmra.mrb[0].mxu1 %v4190_v4  ;;  %v5042_v4 = vld [vmem:[%s6003_s22 + $0x3e8] ss:$16 sps:$4 sm:$0xff]  }
  0xb5   : > { %3440 = vmatpush1.bf16.msra.mxu0 %v4949_v5  ;;  %3768 = vmatpush1.bf16.msra.mxu1 %v4952_v6  ;;  %v5049_v5 = vld [vmem:[%s6003_s22 + $0x404] ss:$16 sps:$4 sm:$0xff]   ;;  %v5052_v6 = vld [vmem:[%s6003_s22 + $0x40c] ss:$16 sps:$4 sm:$0xff]  }
  0xb6   : > { %3441 = vmatprep.subr.bf16.mxu0 %v4957_v7  ;;  %3769 = vmatprep.subr.bf16.mxu1 %v4960_v8  ;;  %v4192_v7 = vcombine.low %v6099_v29, %v6099_v29  ;;  %v5047_v8 = vld [vmem:[%s6003_s22 + $0x400] ss:$16 sps:$4 sm:$0xff]   ;;  %v5082_v29 = vld [vmem:[%s6003_s22 + $0x4ac] ss:$16 sps:$4 sm:$0xff]  }
  0xb7   : > { %3471 = vmatprep.mubr.bf16.mxu0 %v4193_v30  ;;  %3799 = vmatprep.mubr.bf16.mxu1 %v4193_v30  ;;  %v5077_v30 = vld [vmem:[%s6003_s22 + $0x4a0] ss:$16 sps:$4 sm:$0xff]  }
  0xb9   : > { %3442 = vmatpush1.bf16.msra.mxu0 %v4955_v9  ;;  %3770 = vmatpush1.bf16.msra.mxu1 %v4958_v10  ;;  %v5050_v9 = vld [vmem:[%s6003_s22 + $0x408] ss:$16 sps:$4 sm:$0xff]   ;;  %v5055_v10 = vld [vmem:[%s6003_s22 + $0x424] ss:$16 sps:$4 sm:$0xff]  }
  0xba   : > { %3443 = vmatprep.subr.bf16.mxu0 %v4963_v11  ;;  %3771 = vmatprep.subr.bf16.mxu1 %v4966_v12  ;;  %v6148_v11 = vld [vmem:[#allocation2 + $0x10] sm:$0xff]  ;;  %v5058_v12 = vld [vmem:[%s6003_s22 + $0x42c] ss:$16 sps:$4 sm:$0xff]  }
  0xbd   : > { %3444 = vmatpush1.bf16.msra.mxu0 %v4961_v13  ;;  %3772 = vmatpush1.bf16.msra.mxu1 %v4964_v14  ;;  %v4195_v13 = vcombine.high %v6148_v11, %v6148_v11  ;;  %v5053_v14 = vld [vmem:[%s6003_s22 + $0x420] ss:$16 sps:$4 sm:$0xff]  }
  0xbe   : > { %3445 = vmatprep.subr.bf16.mxu0 %v4969_v15  ;;  %3773 = vmatprep.subr.bf16.mxu1 %v4972_v16  ;;  %v5056_v15 = vld [vmem:[%s6003_s22 + $0x428] ss:$16 sps:$4 sm:$0xff]   ;;  %v5061_v16 = vld [vmem:[%s6003_s22 + $0x444] ss:$16 sps:$4 sm:$0xff]  }
  0xc1   : > { %3446 = vmatpush1.bf16.msra.mxu0 %v4967_v17  ;;  %3774 = vmatpush1.bf16.msra.mxu1 %v4970_v18  ;;  %v5064_v17 = vld [vmem:[%s6003_s22 + $0x44c] ss:$16 sps:$4 sm:$0xff]   ;;  %v5059_v18 = vld [vmem:[%s6003_s22 + $0x440] ss:$16 sps:$4 sm:$0xff]  }
  0xc2   : > { %3447 = vmatprep.subr.bf16.mxu0 %v4975_v19  ;;  %3775 = vmatprep.subr.bf16.mxu1 %v4978_v20  ;;  %v5062_v19 = vld [vmem:[%s6003_s22 + $0x448] ss:$16 sps:$4 sm:$0xff]   ;;  %v5067_v20 = vld [vmem:[%s6003_s22 + $0x464] ss:$16 sps:$4 sm:$0xff]  }
  0xc5   : > { %3448 = vmatpush1.bf16.msra.mxu0 %v4973_v21  ;;  %3776 = vmatpush1.bf16.msra.mxu1 %v4976_v22  ;;  %v5070_v21 = vld [vmem:[%s6003_s22 + $0x46c] ss:$16 sps:$4 sm:$0xff]   ;;  %v5065_v22 = vld [vmem:[%s6003_s22 + $0x460] ss:$16 sps:$4 sm:$0xff]  }
  0xc6   : > { %3449 = vmatprep.subr.bf16.mxu0 %v4981_v23  ;;  %3777 = vmatprep.subr.bf16.mxu1 %v4984_v24  ;;  %v5068_v23 = vld [vmem:[%s6003_s22 + $0x468] ss:$16 sps:$4 sm:$0xff]   ;;  %v5073_v24 = vld [vmem:[%s6003_s22 + $0x484] ss:$16 sps:$4 sm:$0xff]  }
  0xc9   : > { %3450 = vmatpush1.bf16.msra.mxu0 %v4979_v25  ;;  %3778 = vmatpush1.bf16.msra.mxu1 %v4982_v26  ;;  %v5076_v25 = vld [vmem:[%s6003_s22 + $0x48c] ss:$16 sps:$4 sm:$0xff]   ;;  %v5071_v26 = vld [vmem:[%s6003_s22 + $0x480] ss:$16 sps:$4 sm:$0xff]  }
  0xca   : > { %3451 = vmatprep.subr.bf16.mxu0 %v4987_v27  ;;  %3779 = vmatprep.subr.bf16.mxu1 %v4990_v28  ;;  %v5074_v27 = vld [vmem:[%s6003_s22 + $0x488] ss:$16 sps:$4 sm:$0xff]   ;;  %v5079_v28 = vld [vmem:[%s6003_s22 + $0x4a4] ss:$16 sps:$4 sm:$0xff]  }
  0xcd   : > { %3452 = vmatpush1.bf16.msra.mxu0 %v4985_v31  ;;  %3780 = vmatpush1.bf16.msra.mxu1 %v4988_v32  ;;  %v5080_v31 = vld [vmem:[%s6003_s22 + $0x4a8] ss:$16 sps:$4 sm:$0xff]   ;;  %v5085_v32 = vld [vmem:[%s6003_s22 + $0x4c4] ss:$16 sps:$4 sm:$0xff]  }
  0xce   : > { %3453 = vmatprep.subr.bf16.mxu0 %v4993_v33  ;;  %3781 = vmatprep.subr.bf16.mxu1 %v4996_v34  ;;  %v5088_v33 = vld [vmem:[%s6003_s22 + $0x4cc] ss:$16 sps:$4 sm:$0xff]   ;;  %v5083_v34 = vld [vmem:[%s6003_s22 + $0x4c0] ss:$16 sps:$4 sm:$0xff]  }
  0xd1   : > { %3454 = vmatpush1.bf16.msra.mxu0 %v4991_v35  ;;  %3782 = vmatpush1.bf16.msra.mxu1 %v4994_v36  ;;  %v5086_v35 = vld [vmem:[%s6003_s22 + $0x4c8] ss:$16 sps:$4 sm:$0xff]   ;;  %v5091_v36 = vld [vmem:[%s6003_s22 + $0x4e4] ss:$16 sps:$4 sm:$0xff]  }
  0xd2   : > { %3455 = vmatprep.subr.bf16.mxu0 %v4999_v37  ;;  %3783 = vmatprep.subr.bf16.mxu1 %v5002_v38  ;;  %v5094_v37 = vld [vmem:[%s6003_s22 + $0x4ec] ss:$16 sps:$4 sm:$0xff]   ;;  %v5089_v38 = vld [vmem:[%s6003_s22 + $0x4e0] ss:$16 sps:$4 sm:$0xff]  }
  0xd5   : > { %3456 = vmatpush1.bf16.msra.mxu0 %v4997_v39  ;;  %3784 = vmatpush1.bf16.msra.mxu1 %v5000_v40  ;;  %v5092_v39 = vld [vmem:[%s6003_s22 + $0x4e8] ss:$16 sps:$4 sm:$0xff]   ;;  %v5097_v40 = vld [vmem:[%s6003_s22 + $0x504] ss:$16 sps:$4 sm:$0xff]  }
  0xd6   : > { %3457 = vmatprep.subr.bf16.mxu0 %v5005_v41  ;;  %3785 = vmatprep.subr.bf16.mxu1 %v5008_v42  ;;  %v5100_v41 = vld [vmem:[%s6003_s22 + $0x50c] ss:$16 sps:$4 sm:$0xff]   ;;  %v5095_v42 = vld [vmem:[%s6003_s22 + $0x500] ss:$16 sps:$4 sm:$0xff]  }
  0xd9   : > { %3458 = vmatpush1.bf16.msra.mxu0 %v5003_v43  ;;  %3786 = vmatpush1.bf16.msra.mxu1 %v5006_v44  ;;  %v5098_v43 = vld [vmem:[%s6003_s22 + $0x508] ss:$16 sps:$4 sm:$0xff]   ;;  %v5103_v44 = vld [vmem:[%s6003_s22 + $0x524] ss:$16 sps:$4 sm:$0xff]  }
  0xda   : > { %3459 = vmatprep.subr.bf16.mxu0 %v5011_v45  ;;  %3787 = vmatprep.subr.bf16.mxu1 %v5014_v46  ;;  %v5106_v45 = vld [vmem:[%s6003_s22 + $0x52c] ss:$16 sps:$4 sm:$0xff]   ;;  %v5101_v46 = vld [vmem:[%s6003_s22 + $0x520] ss:$16 sps:$4 sm:$0xff]  }
  0xdd   : > { %3460 = vmatpush1.bf16.msra.mxu0 %v5009_v47  ;;  %3788 = vmatpush1.bf16.msra.mxu1 %v5012_v48  ;;  %v5104_v47 = vld [vmem:[%s6003_s22 + $0x528] ss:$16 sps:$4 sm:$0xff]   ;;  %v5109_v48 = vld [vmem:[%s6003_s22 + $0x544] ss:$16 sps:$4 sm:$0xff]  }
  0xde   : > { %3461 = vmatprep.subr.bf16.mxu0 %v5017_v49  ;;  %3789 = vmatprep.subr.bf16.mxu1 %v5020_v50  ;;  %v5112_v49 = vld [vmem:[%s6003_s22 + $0x54c] ss:$16 sps:$4 sm:$0xff]   ;;  %v5107_v50 = vld [vmem:[%s6003_s22 + $0x540] ss:$16 sps:$4 sm:$0xff]  }
  0xe1   : > { %3462 = vmatpush1.bf16.msra.mxu0 %v5015_v51  ;;  %3790 = vmatpush1.bf16.msra.mxu1 %v5018_v52  ;;  %v5110_v51 = vld [vmem:[%s6003_s22 + $0x548] ss:$16 sps:$4 sm:$0xff]   ;;  %v5115_v52 = vld [vmem:[%s6003_s22 + $0x564] ss:$16 sps:$4 sm:$0xff]  }
  0xe2   : > { %3463 = vmatprep.subr.bf16.mxu0 %v5023_v53  ;;  %3791 = vmatprep.subr.bf16.mxu1 %v5026_v54  ;;  %v5118_v53 = vld [vmem:[%s6003_s22 + $0x56c] ss:$16 sps:$4 sm:$0xff]   ;;  %v5113_v54 = vld [vmem:[%s6003_s22 + $0x560] ss:$16 sps:$4 sm:$0xff]  }
  0xe5   : > { %3464 = vmatpush1.bf16.msra.mxu0 %v5021_v55  ;;  %3792 = vmatpush1.bf16.msra.mxu1 %v5024_v56  ;;  %v5116_v55 = vld [vmem:[%s6003_s22 + $0x568] ss:$16 sps:$4 sm:$0xff]   ;;  %v5121_v56 = vld [vmem:[%s6003_s22 + $0x584] ss:$16 sps:$4 sm:$0xff]  }
  0xe6   : > { %3465 = vmatprep.subr.bf16.mxu0 %v5029_v57  ;;  %3793 = vmatprep.subr.bf16.mxu1 %v5032_v58  ;;  %v5124_v57 = vld [vmem:[%s6003_s22 + $0x58c] ss:$16 sps:$4 sm:$0xff]   ;;  %v5119_v58 = vld [vmem:[%s6003_s22 + $0x580] ss:$16 sps:$4 sm:$0xff]  }
  0xe9   : > { %3466 = vmatpush1.bf16.msra.mxu0 %v5027_v59  ;;  %3794 = vmatpush1.bf16.msra.mxu1 %v5030_v60  ;;  %v5122_v59 = vld [vmem:[%s6003_s22 + $0x588] ss:$16 sps:$4 sm:$0xff]   ;;  %v5127_v60 = vld [vmem:[%s6003_s22 + $0x5a4] ss:$16 sps:$4 sm:$0xff]  }
  0xea   : > { %3467 = vmatprep.subr.bf16.mxu0 %v5035_v61  ;;  %3795 = vmatprep.subr.bf16.mxu1 %v5038_v62  ;;  %v5130_v61 = vld [vmem:[%s6003_s22 + $0x5ac] ss:$16 sps:$4 sm:$0xff]   ;;  %v5125_v62 = vld [vmem:[%s6003_s22 + $0x5a0] ss:$16 sps:$4 sm:$0xff]  }
  0xed   : > { %3468 = vmatpush1.bf16.msra.mxu0 %v5033_v63  ;;  %3796 = vmatpush1.bf16.msra.mxu1 %v5036_v0  ;;  %v5128_v63 = vld [vmem:[%s6003_s22 + $0x5a8] ss:$16 sps:$4 sm:$0xff]   ;;  %v5133_v0 = vld [vmem:[%s6003_s22 + $0x5c4] ss:$16 sps:$4 sm:$0xff]  }
  0xee   : > { %3469 = vmatprep.subr.bf16.mxu0 %v5041_v1  ;;  %3797 = vmatprep.subr.bf16.mxu1 %v5044_v2  ;;  %v5136_v1 = vld [vmem:[%s6003_s22 + $0x5cc] ss:$16 sps:$4 sm:$0xff]   ;;  %v5131_v2 = vld [vmem:[%s6003_s22 + $0x5c0] ss:$16 sps:$4 sm:$0xff]  }
  0xf1   : > { %3470 = vmatpush1.bf16.msra.mxu0 %v5039_v3  ;;  %3798 = vmatpush1.bf16.msra.mxu1 %v5042_v4  ;;  %v5134_v3 = vld [vmem:[%s6003_s22 + $0x5c8] ss:$16 sps:$4 sm:$0xff]   ;;  %v5139_v4 = vld [vmem:[%s6003_s22 + $0x5e4] ss:$16 sps:$4 sm:$0xff]  }
  0xf2   : > { %3480 = vmatprep.subr.bf16.mxu0 %v5049_v5  ;;  %3808 = vmatprep.subr.bf16.mxu1 %v5052_v6  ;;  %v5142_v5 = vld [vmem:[%s6003_s22 + $0x5ec] ss:$16 sps:$4 sm:$0xff]   ;;  %v5137_v6 = vld [vmem:[%s6003_s22 + $0x5e0] ss:$16 sps:$4 sm:$0xff]  }
  0xf4   : > { %3472 = vmatmul.mubr.bf16.vlgmr.msra.gmra.mrb[0].mxu0 %v4192_v7  ;;  %3800 = vmatmul.mubr.bf16.vlgmr.msra.gmra.mrb[0].mxu1 %v4192_v7  ;;  %v5140_v7 = vld [vmem:[%s6003_s22 + $0x5e8] ss:$16 sps:$4 sm:$0xff]  }
  0xf5   : > { %3481 = vmatpush1.bf16.msra.mxu0 %v5047_v8  ;;  %3809 = vmatpush1.bf16.msra.mxu1 %v5050_v9  ;;  %v5147_v8 = vld [vmem:[%s6003_s22 + $0x604] ss:$16 sps:$4 sm:$0xff]   ;;  %v5150_v9 = vld [vmem:[%s6003_s22 + $0x60c] ss:$16 sps:$4 sm:$0xff]  }
  0xf6   : > { %3482 = vmatprep.subr.bf16.mxu0 %v5055_v10  ;;  %3810 = vmatprep.subr.bf16.mxu1 %v5058_v12  ;;  %v5145_v10 = vld [vmem:[%s6003_s22 + $0x600] ss:$16 sps:$4 sm:$0xff]   ;;  %v4194_v12 = vcombine.low %v6148_v11, %v6148_v11 }
  0xf7   : > { %3512 = vmatprep.mubr.bf16.mxu0 %v4195_v13  ;;  %3840 = vmatprep.mubr.bf16.mxu1 %v4195_v13  ;;  %v5148_v13 = vld [vmem:[%s6003_s22 + $0x608] ss:$16 sps:$4 sm:$0xff]   ;;  %v5151_v11 = vld [vmem:[%s6003_s22 + $0x620] ss:$16 sps:$4 sm:$0xff]  }
  0xf9   : > { %3483 = vmatpush1.bf16.msra.mxu0 %v5053_v14  ;;  %3811 = vmatpush1.bf16.msra.mxu1 %v5056_v15  ;;  %v6217_v14 = vld [vmem:[#allocation2 + $0x18] sm:$0xff]  ;;  %v5153_v15 = vld [vmem:[%s6003_s22 + $0x624] ss:$16 sps:$4 sm:$0xff]  }
  0xfa   : > { %3484 = vmatprep.subr.bf16.mxu0 %v5061_v16  ;;  %3812 = vmatprep.subr.bf16.mxu1 %v5064_v17  ;;  %v5156_v16 = vld [vmem:[%s6003_s22 + $0x62c] ss:$16 sps:$4 sm:$0xff]   ;;  %v4197_v17 = vcombine.high %v6217_v14, %v6217_v14 }
  0xfd   : > { %3485 = vmatpush1.bf16.msra.mxu0 %v5059_v18  ;;  %3813 = vmatpush1.bf16.msra.mxu1 %v5062_v19  ;;  %v5154_v18 = vld [vmem:[%s6003_s22 + $0x628] ss:$16 sps:$4 sm:$0xff]   ;;  %v5159_v19 = vld [vmem:[%s6003_s22 + $0x644] ss:$16 sps:$4 sm:$0xff]  }
  0xfe   : > { %3486 = vmatprep.subr.bf16.mxu0 %v5067_v20  ;;  %3814 = vmatprep.subr.bf16.mxu1 %v5070_v21  ;;  %v5162_v20 = vld [vmem:[%s6003_s22 + $0x64c] ss:$16 sps:$4 sm:$0xff]   ;;  %v5157_v21 = vld [vmem:[%s6003_s22 + $0x640] ss:$16 sps:$4 sm:$0xff]  }
 0x101   : > { %3487 = vmatpush1.bf16.msra.mxu0 %v5065_v22  ;;  %3815 = vmatpush1.bf16.msra.mxu1 %v5068_v23  ;;  %v5160_v22 = vld [vmem:[%s6003_s22 + $0x648] ss:$16 sps:$4 sm:$0xff]   ;;  %v5165_v23 = vld [vmem:[%s6003_s22 + $0x664] ss:$16 sps:$4 sm:$0xff]  }
 0x102   : > { %3488 = vmatprep.subr.bf16.mxu0 %v5073_v24  ;;  %3816 = vmatprep.subr.bf16.mxu1 %v5076_v25  ;;  %v5168_v24 = vld [vmem:[%s6003_s22 + $0x66c] ss:$16 sps:$4 sm:$0xff]   ;;  %v5163_v25 = vld [vmem:[%s6003_s22 + $0x660] ss:$16 sps:$4 sm:$0xff]  }
 0x105   : > { %3489 = vmatpush1.bf16.msra.mxu0 %v5071_v26  ;;  %3817 = vmatpush1.bf16.msra.mxu1 %v5074_v27  ;;  %v5166_v26 = vld [vmem:[%s6003_s22 + $0x668] ss:$16 sps:$4 sm:$0xff]   ;;  %v5171_v27 = vld [vmem:[%s6003_s22 + $0x684] ss:$16 sps:$4 sm:$0xff]  }
 0x106   : > { %3490 = vmatprep.subr.bf16.mxu0 %v5079_v28  ;;  %3818 = vmatprep.subr.bf16.mxu1 %v5082_v29  ;;  %v5174_v28 = vld [vmem:[%s6003_s22 + $0x68c] ss:$16 sps:$4 sm:$0xff]   ;;  %v5169_v29 = vld [vmem:[%s6003_s22 + $0x680] ss:$16 sps:$4 sm:$0xff]  }
 0x109   : > { %3491 = vmatpush1.bf16.msra.mxu0 %v5077_v30  ;;  %3819 = vmatpush1.bf16.msra.mxu1 %v5080_v31  ;;  %v5172_v30 = vld [vmem:[%s6003_s22 + $0x688] ss:$16 sps:$4 sm:$0xff]   ;;  %v5177_v31 = vld [vmem:[%s6003_s22 + $0x6a4] ss:$16 sps:$4 sm:$0xff]  }
 0x10a   : > { %3492 = vmatprep.subr.bf16.mxu0 %v5085_v32  ;;  %3820 = vmatprep.subr.bf16.mxu1 %v5088_v33  ;;  %v5180_v32 = vld [vmem:[%s6003_s22 + $0x6ac] ss:$16 sps:$4 sm:$0xff]   ;;  %v5175_v33 = vld [vmem:[%s6003_s22 + $0x6a0] ss:$16 sps:$4 sm:$0xff]  }
 0x10d   : > { %3493 = vmatpush1.bf16.msra.mxu0 %v5083_v34  ;;  %3821 = vmatpush1.bf16.msra.mxu1 %v5086_v35  ;;  %v5178_v34 = vld [vmem:[%s6003_s22 + $0x6a8] ss:$16 sps:$4 sm:$0xff]   ;;  %v5183_v35 = vld [vmem:[%s6003_s22 + $0x6c4] ss:$16 sps:$4 sm:$0xff]  }
 0x10e   : > { %3494 = vmatprep.subr.bf16.mxu0 %v5091_v36  ;;  %3822 = vmatprep.subr.bf16.mxu1 %v5094_v37  ;;  %v5186_v36 = vld [vmem:[%s6003_s22 + $0x6cc] ss:$16 sps:$4 sm:$0xff]   ;;  %v5181_v37 = vld [vmem:[%s6003_s22 + $0x6c0] ss:$16 sps:$4 sm:$0xff]  }
 0x111   : > { %3495 = vmatpush1.bf16.msra.mxu0 %v5089_v38  ;;  %3823 = vmatpush1.bf16.msra.mxu1 %v5092_v39  ;;  %v5184_v38 = vld [vmem:[%s6003_s22 + $0x6c8] ss:$16 sps:$4 sm:$0xff]   ;;  %v5189_v39 = vld [vmem:[%s6003_s22 + $0x6e4] ss:$16 sps:$4 sm:$0xff]  }
 0x112   : > { %3496 = vmatprep.subr.bf16.mxu0 %v5097_v40  ;;  %3824 = vmatprep.subr.bf16.mxu1 %v5100_v41  ;;  %v5192_v40 = vld [vmem:[%s6003_s22 + $0x6ec] ss:$16 sps:$4 sm:$0xff]   ;;  %v5187_v41 = vld [vmem:[%s6003_s22 + $0x6e0] ss:$16 sps:$4 sm:$0xff]  }
 0x115   : > { %3497 = vmatpush1.bf16.msra.mxu0 %v5095_v42  ;;  %3825 = vmatpush1.bf16.msra.mxu1 %v5098_v43  ;;  %v5190_v42 = vld [vmem:[%s6003_s22 + $0x6e8] ss:$16 sps:$4 sm:$0xff]   ;;  %v5195_v43 = vld [vmem:[%s6003_s22 + $0x704] ss:$16 sps:$4 sm:$0xff]  }
 0x116   : > { %3498 = vmatprep.subr.bf16.mxu0 %v5103_v44  ;;  %3826 = vmatprep.subr.bf16.mxu1 %v5106_v45  ;;  %v5198_v44 = vld [vmem:[%s6003_s22 + $0x70c] ss:$16 sps:$4 sm:$0xff]   ;;  %v5193_v45 = vld [vmem:[%s6003_s22 + $0x700] ss:$16 sps:$4 sm:$0xff]  }
 0x119   : > { %3499 = vmatpush1.bf16.msra.mxu0 %v5101_v46  ;;  %3827 = vmatpush1.bf16.msra.mxu1 %v5104_v47  ;;  %v5196_v46 = vld [vmem:[%s6003_s22 + $0x708] ss:$16 sps:$4 sm:$0xff]   ;;  %v5201_v47 = vld [vmem:[%s6003_s22 + $0x724] ss:$16 sps:$4 sm:$0xff]  }
 0x11a   : > { %3500 = vmatprep.subr.bf16.mxu0 %v5109_v48  ;;  %3828 = vmatprep.subr.bf16.mxu1 %v5112_v49  ;;  %v5204_v48 = vld [vmem:[%s6003_s22 + $0x72c] ss:$16 sps:$4 sm:$0xff]   ;;  %v5199_v49 = vld [vmem:[%s6003_s22 + $0x720] ss:$16 sps:$4 sm:$0xff]  }
 0x11d   : > { %3501 = vmatpush1.bf16.msra.mxu0 %v5107_v50  ;;  %3829 = vmatpush1.bf16.msra.mxu1 %v5110_v51  ;;  %v5202_v50 = vld [vmem:[%s6003_s22 + $0x728] ss:$16 sps:$4 sm:$0xff]   ;;  %v5207_v51 = vld [vmem:[%s6003_s22 + $0x744] ss:$16 sps:$4 sm:$0xff]  }
 0x11e   : > { %3502 = vmatprep.subr.bf16.mxu0 %v5115_v52  ;;  %3830 = vmatprep.subr.bf16.mxu1 %v5118_v53  ;;  %v5210_v52 = vld [vmem:[%s6003_s22 + $0x74c] ss:$16 sps:$4 sm:$0xff]   ;;  %v5205_v53 = vld [vmem:[%s6003_s22 + $0x740] ss:$16 sps:$4 sm:$0xff]  }
 0x121   : > { %3503 = vmatpush1.bf16.msra.mxu0 %v5113_v54  ;;  %3831 = vmatpush1.bf16.msra.mxu1 %v5116_v55  ;;  %v5208_v54 = vld [vmem:[%s6003_s22 + $0x748] ss:$16 sps:$4 sm:$0xff]   ;;  %v5213_v55 = vld [vmem:[%s6003_s22 + $0x764] ss:$16 sps:$4 sm:$0xff]  }
 0x122   : > { %3504 = vmatprep.subr.bf16.mxu0 %v5121_v56  ;;  %3832 = vmatprep.subr.bf16.mxu1 %v5124_v57  ;;  %v5216_v56 = vld [vmem:[%s6003_s22 + $0x76c] ss:$16 sps:$4 sm:$0xff]   ;;  %v5211_v57 = vld [vmem:[%s6003_s22 + $0x760] ss:$16 sps:$4 sm:$0xff]  }
 0x125   : > { %3505 = vmatpush1.bf16.msra.mxu0 %v5119_v58  ;;  %3833 = vmatpush1.bf16.msra.mxu1 %v5122_v59  ;;  %v5214_v58 = vld [vmem:[%s6003_s22 + $0x768] ss:$16 sps:$4 sm:$0xff]   ;;  %v5219_v59 = vld [vmem:[%s6003_s22 + $0x784] ss:$16 sps:$4 sm:$0xff]  }
 0x126   : > { %3506 = vmatprep.subr.bf16.mxu0 %v5127_v60  ;;  %3834 = vmatprep.subr.bf16.mxu1 %v5130_v61  ;;  %v5222_v60 = vld [vmem:[%s6003_s22 + $0x78c] ss:$16 sps:$4 sm:$0xff]   ;;  %v5217_v61 = vld [vmem:[%s6003_s22 + $0x780] ss:$16 sps:$4 sm:$0xff]  }
 0x129   : > { %3507 = vmatpush1.bf16.msra.mxu0 %v5125_v62  ;;  %3835 = vmatpush1.bf16.msra.mxu1 %v5128_v63  ;;  %v5220_v62 = vld [vmem:[%s6003_s22 + $0x788] ss:$16 sps:$4 sm:$0xff]   ;;  %v5225_v63 = vld [vmem:[%s6003_s22 + $0x7a4] ss:$16 sps:$4 sm:$0xff]  }
 0x12a   : > { %3508 = vmatprep.subr.bf16.mxu0 %v5133_v0  ;;  %3836 = vmatprep.subr.bf16.mxu1 %v5136_v1  ;;  %v5228_v0 = vld [vmem:[%s6003_s22 + $0x7ac] ss:$16 sps:$4 sm:$0xff]   ;;  %v5223_v1 = vld [vmem:[%s6003_s22 + $0x7a0] ss:$16 sps:$4 sm:$0xff]  }
 0x12d   : > { %3509 = vmatpush1.bf16.msra.mxu0 %v5131_v2  ;;  %3837 = vmatpush1.bf16.msra.mxu1 %v5134_v3  ;;  %v5226_v2 = vld [vmem:[%s6003_s22 + $0x7a8] ss:$16 sps:$4 sm:$0xff]   ;;  %v5231_v3 = vld [vmem:[%s6003_s22 + $0x7c4] ss:$16 sps:$4 sm:$0xff]  }
 0x12e   : > { %3510 = vmatprep.subr.bf16.mxu0 %v5139_v4  ;;  %3838 = vmatprep.subr.bf16.mxu1 %v5142_v5  ;;  %v5234_v4 = vld [vmem:[%s6003_s22 + $0x7cc] ss:$16 sps:$4 sm:$0xff]   ;;  %v5229_v5 = vld [vmem:[%s6003_s22 + $0x7c0] ss:$16 sps:$4 sm:$0xff]  }
 0x131   : > { %3511 = vmatpush1.bf16.msra.mxu0 %v5137_v6  ;;  %3839 = vmatpush1.bf16.msra.mxu1 %v5140_v7  ;;  %v5232_v6 = vld [vmem:[%s6003_s22 + $0x7c8] ss:$16 sps:$4 sm:$0xff]   ;;  %v5237_v7 = vld [vmem:[%s6003_s22 + $0x7e4] ss:$16 sps:$4 sm:$0xff]  }
 0x132   : > { %3521 = vmatprep.subr.bf16.mxu0 %v5147_v8  ;;  %3849 = vmatprep.subr.bf16.mxu1 %v5150_v9  ;;  %v5240_v8 = vld [vmem:[%s6003_s22 + $0x7ec] ss:$16 sps:$4 sm:$0xff]   ;;  %v5235_v9 = vld [vmem:[%s6003_s22 + $0x7e0] ss:$16 sps:$4 sm:$0xff]  }
 0x134   : > { %3513 = vmatmul.mubr.bf16.vlgmr.msra.gmra.mrb[0].mxu0 %v4194_v12  ;;  %3841 = vmatmul.mubr.bf16.vlgmr.msra.gmra.mrb[0].mxu1 %v4194_v12  ;;  %v5245_v12 = vld [vmem:[%s6003_s22 + $0x804] ss:$16 sps:$4 sm:$0xff]  }
 0x135   : > { %3522 = vmatpush1.bf16.msra.mxu0 %v5145_v10  ;;  %3850 = vmatpush1.bf16.msra.mxu1 %v5148_v13  ;;  %v5238_v10 = vld [vmem:[%s6003_s22 + $0x7e8] ss:$16 sps:$4 sm:$0xff]   ;;  %v5248_v13 = vld [vmem:[%s6003_s22 + $0x80c] ss:$16 sps:$4 sm:$0xff]  }
 0x136   : > { %3523 = vmatprep.subr.bf16.mxu0 %v5153_v15  ;;  %3851 = vmatprep.subr.bf16.mxu1 %v5156_v16  ;;  %v5243_v15 = vld [vmem:[%s6003_s22 + $0x800] ss:$16 sps:$4 sm:$0xff]   ;;  %v4196_v16 = vcombine.low %v6217_v14, %v6217_v14 }
 0x137   : > { %3553 = vmatprep.mubr.bf16.mxu0 %v4197_v17  ;;  %3881 = vmatprep.mubr.bf16.mxu1 %v4197_v17  ;;  %v6286_v17 = vld [vmem:[#allocation2 + $0x20] sm:$0xff] }
 0x138   : > { %v5249_v14 = vld [vmem:[%s6003_s22 + $0x820] ss:$16 sps:$4 sm:$0xff]  }
 0x139   : > { %3524 = vmatpush1.bf16.msra.mxu0 %v5151_v11  ;;  %3852 = vmatpush1.bf16.msra.mxu1 %v5154_v18  ;;  %v5246_v11 = vld [vmem:[%s6003_s22 + $0x808] ss:$16 sps:$4 sm:$0xff]   ;;  %v5251_v18 = vld [vmem:[%s6003_s22 + $0x824] ss:$16 sps:$4 sm:$0xff]  }
 0x13a   : > { %3525 = vmatprep.subr.bf16.mxu0 %v5159_v19  ;;  %3853 = vmatprep.subr.bf16.mxu1 %v5162_v20  ;;  %v5254_v19 = vld [vmem:[%s6003_s22 + $0x82c] ss:$16 sps:$4 sm:$0xff]   ;;  %v4199_v20 = vcombine.high %v6286_v17, %v6286_v17 }
 0x13d   : > { %3526 = vmatpush1.bf16.msra.mxu0 %v5157_v21  ;;  %3854 = vmatpush1.bf16.msra.mxu1 %v5160_v22  ;;  %v5252_v21 = vld [vmem:[%s6003_s22 + $0x828] ss:$16 sps:$4 sm:$0xff]   ;;  %v5257_v22 = vld [vmem:[%s6003_s22 + $0x844] ss:$16 sps:$4 sm:$0xff]  }
 0x13e   : > { %3527 = vmatprep.subr.bf16.mxu0 %v5165_v23  ;;  %3855 = vmatprep.subr.bf16.mxu1 %v5168_v24  ;;  %v5260_v23 = vld [vmem:[%s6003_s22 + $0x84c] ss:$16 sps:$4 sm:$0xff]   ;;  %v5255_v24 = vld [vmem:[%s6003_s22 + $0x840] ss:$16 sps:$4 sm:$0xff]  }
 0x141   : > { %3528 = vmatpush1.bf16.msra.mxu0 %v5163_v25  ;;  %3856 = vmatpush1.bf16.msra.mxu1 %v5166_v26  ;;  %v5258_v25 = vld [vmem:[%s6003_s22 + $0x848] ss:$16 sps:$4 sm:$0xff]   ;;  %v5263_v26 = vld [vmem:[%s6003_s22 + $0x864] ss:$16 sps:$4 sm:$0xff]  }
 0x142   : > { %3529 = vmatprep.subr.bf16.mxu0 %v5171_v27  ;;  %3857 = vmatprep.subr.bf16.mxu1 %v5174_v28  ;;  %v5266_v27 = vld [vmem:[%s6003_s22 + $0x86c] ss:$16 sps:$4 sm:$0xff]   ;;  %v5261_v28 = vld [vmem:[%s6003_s22 + $0x860] ss:$16 sps:$4 sm:$0xff]  }
 0x145   : > { %3530 = vmatpush1.bf16.msra.mxu0 %v5169_v29  ;;  %3858 = vmatpush1.bf16.msra.mxu1 %v5172_v30  ;;  %v5264_v29 = vld [vmem:[%s6003_s22 + $0x868] ss:$16 sps:$4 sm:$0xff]   ;;  %v5269_v30 = vld [vmem:[%s6003_s22 + $0x884] ss:$16 sps:$4 sm:$0xff]  }
 0x146   : > { %3531 = vmatprep.subr.bf16.mxu0 %v5177_v31  ;;  %3859 = vmatprep.subr.bf16.mxu1 %v5180_v32  ;;  %v5272_v31 = vld [vmem:[%s6003_s22 + $0x88c] ss:$16 sps:$4 sm:$0xff]   ;;  %v5267_v32 = vld [vmem:[%s6003_s22 + $0x880] ss:$16 sps:$4 sm:$0xff]  }
 0x149   : > { %3532 = vmatpush1.bf16.msra.mxu0 %v5175_v33  ;;  %3860 = vmatpush1.bf16.msra.mxu1 %v5178_v34  ;;  %v5270_v33 = vld [vmem:[%s6003_s22 + $0x888] ss:$16 sps:$4 sm:$0xff]   ;;  %v5275_v34 = vld [vmem:[%s6003_s22 + $0x8a4] ss:$16 sps:$4 sm:$0xff]  }
 0x14a   : > { %3533 = vmatprep.subr.bf16.mxu0 %v5183_v35  ;;  %3861 = vmatprep.subr.bf16.mxu1 %v5186_v36  ;;  %v5278_v35 = vld [vmem:[%s6003_s22 + $0x8ac] ss:$16 sps:$4 sm:$0xff]   ;;  %v5273_v36 = vld [vmem:[%s6003_s22 + $0x8a0] ss:$16 sps:$4 sm:$0xff]  }
 0x14d   : > { %3534 = vmatpush1.bf16.msra.mxu0 %v5181_v37  ;;  %3862 = vmatpush1.bf16.msra.mxu1 %v5184_v38  ;;  %v5276_v37 = vld [vmem:[%s6003_s22 + $0x8a8] ss:$16 sps:$4 sm:$0xff]   ;;  %v5281_v38 = vld [vmem:[%s6003_s22 + $0x8c4] ss:$16 sps:$4 sm:$0xff]  }
 0x14e   : > { %3535 = vmatprep.subr.bf16.mxu0 %v5189_v39  ;;  %3863 = vmatprep.subr.bf16.mxu1 %v5192_v40  ;;  %v5284_v39 = vld [vmem:[%s6003_s22 + $0x8cc] ss:$16 sps:$4 sm:$0xff]   ;;  %v5279_v40 = vld [vmem:[%s6003_s22 + $0x8c0] ss:$16 sps:$4 sm:$0xff]  }
 0x151   : > { %3536 = vmatpush1.bf16.msra.mxu0 %v5187_v41  ;;  %3864 = vmatpush1.bf16.msra.mxu1 %v5190_v42  ;;  %v5282_v41 = vld [vmem:[%s6003_s22 + $0x8c8] ss:$16 sps:$4 sm:$0xff]   ;;  %v5287_v42 = vld [vmem:[%s6003_s22 + $0x8e4] ss:$16 sps:$4 sm:$0xff]  }
 0x152   : > { %3537 = vmatprep.subr.bf16.mxu0 %v5195_v43  ;;  %3865 = vmatprep.subr.bf16.mxu1 %v5198_v44  ;;  %v5290_v43 = vld [vmem:[%s6003_s22 + $0x8ec] ss:$16 sps:$4 sm:$0xff]   ;;  %v5285_v44 = vld [vmem:[%s6003_s22 + $0x8e0] ss:$16 sps:$4 sm:$0xff]  }
 0x155   : > { %3538 = vmatpush1.bf16.msra.mxu0 %v5193_v45  ;;  %3866 = vmatpush1.bf16.msra.mxu1 %v5196_v46  ;;  %v5288_v45 = vld [vmem:[%s6003_s22 + $0x8e8] ss:$16 sps:$4 sm:$0xff]   ;;  %v5293_v46 = vld [vmem:[%s6003_s22 + $0x904] ss:$16 sps:$4 sm:$0xff]  }
 0x156   : > { %3539 = vmatprep.subr.bf16.mxu0 %v5201_v47  ;;  %3867 = vmatprep.subr.bf16.mxu1 %v5204_v48  ;;  %v5296_v47 = vld [vmem:[%s6003_s22 + $0x90c] ss:$16 sps:$4 sm:$0xff]   ;;  %v5291_v48 = vld [vmem:[%s6003_s22 + $0x900] ss:$16 sps:$4 sm:$0xff]  }
 0x159   : > { %3540 = vmatpush1.bf16.msra.mxu0 %v5199_v49  ;;  %3868 = vmatpush1.bf16.msra.mxu1 %v5202_v50  ;;  %v5294_v49 = vld [vmem:[%s6003_s22 + $0x908] ss:$16 sps:$4 sm:$0xff]   ;;  %v5299_v50 = vld [vmem:[%s6003_s22 + $0x924] ss:$16 sps:$4 sm:$0xff]  }
 0x15a   : > { %3541 = vmatprep.subr.bf16.mxu0 %v5207_v51  ;;  %3869 = vmatprep.subr.bf16.mxu1 %v5210_v52  ;;  %v5302_v51 = vld [vmem:[%s6003_s22 + $0x92c] ss:$16 sps:$4 sm:$0xff]   ;;  %v5297_v52 = vld [vmem:[%s6003_s22 + $0x920] ss:$16 sps:$4 sm:$0xff]  }
 0x15d   : > { %3542 = vmatpush1.bf16.msra.mxu0 %v5205_v53  ;;  %3870 = vmatpush1.bf16.msra.mxu1 %v5208_v54  ;;  %v5300_v53 = vld [vmem:[%s6003_s22 + $0x928] ss:$16 sps:$4 sm:$0xff]   ;;  %v5305_v54 = vld [vmem:[%s6003_s22 + $0x944] ss:$16 sps:$4 sm:$0xff]  }
 0x15e   : > { %3543 = vmatprep.subr.bf16.mxu0 %v5213_v55  ;;  %3871 = vmatprep.subr.bf16.mxu1 %v5216_v56  ;;  %v5308_v55 = vld [vmem:[%s6003_s22 + $0x94c] ss:$16 sps:$4 sm:$0xff]   ;;  %v5303_v56 = vld [vmem:[%s6003_s22 + $0x940] ss:$16 sps:$4 sm:$0xff]  }
 0x161   : > { %3544 = vmatpush1.bf16.msra.mxu0 %v5211_v57  ;;  %3872 = vmatpush1.bf16.msra.mxu1 %v5214_v58  ;;  %v5306_v57 = vld [vmem:[%s6003_s22 + $0x948] ss:$16 sps:$4 sm:$0xff]   ;;  %v5311_v58 = vld [vmem:[%s6003_s22 + $0x964] ss:$16 sps:$4 sm:$0xff]  }
 0x162   : > { %3545 = vmatprep.subr.bf16.mxu0 %v5219_v59  ;;  %3873 = vmatprep.subr.bf16.mxu1 %v5222_v60  ;;  %v5314_v59 = vld [vmem:[%s6003_s22 + $0x96c] ss:$16 sps:$4 sm:$0xff]   ;;  %v5309_v60 = vld [vmem:[%s6003_s22 + $0x960] ss:$16 sps:$4 sm:$0xff]  }
 0x165   : > { %3546 = vmatpush1.bf16.msra.mxu0 %v5217_v61  ;;  %3874 = vmatpush1.bf16.msra.mxu1 %v5220_v62  ;;  %v5312_v61 = vld [vmem:[%s6003_s22 + $0x968] ss:$16 sps:$4 sm:$0xff]   ;;  %v5317_v62 = vld [vmem:[%s6003_s22 + $0x984] ss:$16 sps:$4 sm:$0xff]  }
 0x166   : > { %3547 = vmatprep.subr.bf16.mxu0 %v5225_v63  ;;  %3875 = vmatprep.subr.bf16.mxu1 %v5228_v0  ;;  %v5320_v63 = vld [vmem:[%s6003_s22 + $0x98c] ss:$16 sps:$4 sm:$0xff]   ;;  %v5315_v0 = vld [vmem:[%s6003_s22 + $0x980] ss:$16 sps:$4 sm:$0xff]  }
 0x169   : > { %3548 = vmatpush1.bf16.msra.mxu0 %v5223_v1  ;;  %3876 = vmatpush1.bf16.msra.mxu1 %v5226_v2  ;;  %v5318_v1 = vld [vmem:[%s6003_s22 + $0x988] ss:$16 sps:$4 sm:$0xff]   ;;  %v5323_v2 = vld [vmem:[%s6003_s22 + $0x9a4] ss:$16 sps:$4 sm:$0xff]  }
 0x16a   : > { %3549 = vmatprep.subr.bf16.mxu0 %v5231_v3  ;;  %3877 = vmatprep.subr.bf16.mxu1 %v5234_v4  ;;  %v5326_v3 = vld [vmem:[%s6003_s22 + $0x9ac] ss:$16 sps:$4 sm:$0xff]   ;;  %v5321_v4 = vld [vmem:[%s6003_s22 + $0x9a0] ss:$16 sps:$4 sm:$0xff]  }
 0x16d   : > { %3550 = vmatpush1.bf16.msra.mxu0 %v5229_v5  ;;  %3878 = vmatpush1.bf16.msra.mxu1 %v5232_v6  ;;  %v5324_v5 = vld [vmem:[%s6003_s22 + $0x9a8] ss:$16 sps:$4 sm:$0xff]   ;;  %v5329_v6 = vld [vmem:[%s6003_s22 + $0x9c4] ss:$16 sps:$4 sm:$0xff]  }
 0x16e   : > { %3551 = vmatprep.subr.bf16.mxu0 %v5237_v7  ;;  %3879 = vmatprep.subr.bf16.mxu1 %v5240_v8  ;;  %v5332_v7 = vld [vmem:[%s6003_s22 + $0x9cc] ss:$16 sps:$4 sm:$0xff]   ;;  %v5327_v8 = vld [vmem:[%s6003_s22 + $0x9c0] ss:$16 sps:$4 sm:$0xff]  }
 0x171   : > { %3552 = vmatpush1.bf16.msra.mxu0 %v5235_v9  ;;  %3880 = vmatpush1.bf16.msra.mxu1 %v5238_v10  ;;  %v5330_v9 = vld [vmem:[%s6003_s22 + $0x9c8] ss:$16 sps:$4 sm:$0xff]   ;;  %v5335_v10 = vld [vmem:[%s6003_s22 + $0x9e4] ss:$16 sps:$4 sm:$0xff]  }
 0x172   : > { %3562 = vmatprep.subr.bf16.mxu0 %v5245_v12  ;;  %3890 = vmatprep.subr.bf16.mxu1 %v5248_v13  ;;  %v5338_v12 = vld [vmem:[%s6003_s22 + $0x9ec] ss:$16 sps:$4 sm:$0xff]   ;;  %v5333_v13 = vld [vmem:[%s6003_s22 + $0x9e0] ss:$16 sps:$4 sm:$0xff]  }
 0x174   : > { %3554 = vmatmul.mubr.bf16.vlgmr.msra.gmra.mrb[0].mxu0 %v4196_v16  ;;  %3882 = vmatmul.mubr.bf16.vlgmr.msra.gmra.mrb[0].mxu1 %v4196_v16  ;;  %v5343_v16 = vld [vmem:[%s6003_s22 + $0xa04] ss:$16 sps:$4 sm:$0xff]  }
 0x175   : > { %3563 = vmatpush1.bf16.msra.mxu0 %v5243_v15  ;;  %3891 = vmatpush1.bf16.msra.mxu1 %v5246_v11  ;;  %v5336_v15 = vld [vmem:[%s6003_s22 + $0x9e8] ss:$16 sps:$4 sm:$0xff]   ;;  %v5346_v11 = vld [vmem:[%s6003_s22 + $0xa0c] ss:$16 sps:$4 sm:$0xff]  }
 0x176   : > { %3564 = vmatprep.subr.bf16.mxu0 %v5251_v18  ;;  %3892 = vmatprep.subr.bf16.mxu1 %v5254_v19  ;;  %v6353_v18 = vld [vmem:[#allocation2 + $0x28] sm:$0xff]  ;;  %v4198_v19 = vcombine.low %v6286_v17, %v6286_v17  ;;  %v5347_v17 = vld [vmem:[%s6003_s22 + $0xa20] ss:$16 sps:$4 sm:$0xff]  }
 0x177   : > { %3594 = vmatprep.mubr.bf16.mxu0 %v4199_v20  ;;  %3922 = vmatprep.mubr.bf16.mxu1 %v4199_v20  ;;  %v5341_v20 = vld [vmem:[%s6003_s22 + $0xa00] ss:$16 sps:$4 sm:$0xff]  }
 0x179   : > { %3565 = vmatpush1.bf16.msra.mxu0 %v5249_v14  ;;  %3893 = vmatpush1.bf16.msra.mxu1 %v5252_v21  ;;  %v5344_v14 = vld [vmem:[%s6003_s22 + $0xa08] ss:$16 sps:$4 sm:$0xff]   ;;  %v5349_v21 = vld [vmem:[%s6003_s22 + $0xa24] ss:$16 sps:$4 sm:$0xff]  }
 0x17a   : > { %3566 = vmatprep.subr.bf16.mxu0 %v5257_v22  ;;  %3894 = vmatprep.subr.bf16.mxu1 %v5260_v23  ;;  %v5352_v22 = vld [vmem:[%s6003_s22 + $0xa2c] ss:$16 sps:$4 sm:$0xff]   ;;  %v4201_v23 = vcombine.high %v6353_v18, %v6353_v18 }
 0x17d   : > { %3567 = vmatpush1.bf16.msra.mxu0 %v5255_v24  ;;  %3895 = vmatpush1.bf16.msra.mxu1 %v5258_v25  ;;  %v5350_v24 = vld [vmem:[%s6003_s22 + $0xa28] ss:$16 sps:$4 sm:$0xff]   ;;  %v5355_v25 = vld [vmem:[%s6003_s22 + $0xa44] ss:$16 sps:$4 sm:$0xff]  }
 0x17e   : > { %3568 = vmatprep.subr.bf16.mxu0 %v5263_v26  ;;  %3896 = vmatprep.subr.bf16.mxu1 %v5266_v27  ;;  %v5358_v26 = vld [vmem:[%s6003_s22 + $0xa4c] ss:$16 sps:$4 sm:$0xff]   ;;  %v5353_v27 = vld [vmem:[%s6003_s22 + $0xa40] ss:$16 sps:$4 sm:$0xff]  }
 0x181   : > { %3569 = vmatpush1.bf16.msra.mxu0 %v5261_v28  ;;  %3897 = vmatpush1.bf16.msra.mxu1 %v5264_v29  ;;  %v5356_v28 = vld [vmem:[%s6003_s22 + $0xa48] ss:$16 sps:$4 sm:$0xff]   ;;  %v5361_v29 = vld [vmem:[%s6003_s22 + $0xa64] ss:$16 sps:$4 sm:$0xff]  }
 0x182   : > { %3570 = vmatprep.subr.bf16.mxu0 %v5269_v30  ;;  %3898 = vmatprep.subr.bf16.mxu1 %v5272_v31  ;;  %v5364_v30 = vld [vmem:[%s6003_s22 + $0xa6c] ss:$16 sps:$4 sm:$0xff]   ;;  %v5359_v31 = vld [vmem:[%s6003_s22 + $0xa60] ss:$16 sps:$4 sm:$0xff]  }
 0x185   : > { %3571 = vmatpush1.bf16.msra.mxu0 %v5267_v32  ;;  %3899 = vmatpush1.bf16.msra.mxu1 %v5270_v33  ;;  %v5362_v32 = vld [vmem:[%s6003_s22 + $0xa68] ss:$16 sps:$4 sm:$0xff]   ;;  %v5367_v33 = vld [vmem:[%s6003_s22 + $0xa84] ss:$16 sps:$4 sm:$0xff]  }
 0x186   : > { %3572 = vmatprep.subr.bf16.mxu0 %v5275_v34  ;;  %3900 = vmatprep.subr.bf16.mxu1 %v5278_v35  ;;  %v5370_v34 = vld [vmem:[%s6003_s22 + $0xa8c] ss:$16 sps:$4 sm:$0xff]   ;;  %v5365_v35 = vld [vmem:[%s6003_s22 + $0xa80] ss:$16 sps:$4 sm:$0xff]  }
 0x189   : > { %3573 = vmatpush1.bf16.msra.mxu0 %v5273_v36  ;;  %3901 = vmatpush1.bf16.msra.mxu1 %v5276_v37  ;;  %v5368_v36 = vld [vmem:[%s6003_s22 + $0xa88] ss:$16 sps:$4 sm:$0xff]   ;;  %v5373_v37 = vld [vmem:[%s6003_s22 + $0xaa4] ss:$16 sps:$4 sm:$0xff]  }
 0x18a   : > { %3574 = vmatprep.subr.bf16.mxu0 %v5281_v38  ;;  %3902 = vmatprep.subr.bf16.mxu1 %v5284_v39  ;;  %v5376_v38 = vld [vmem:[%s6003_s22 + $0xaac] ss:$16 sps:$4 sm:$0xff]   ;;  %v5371_v39 = vld [vmem:[%s6003_s22 + $0xaa0] ss:$16 sps:$4 sm:$0xff]  }
 0x18d   : > { %3575 = vmatpush1.bf16.msra.mxu0 %v5279_v40  ;;  %3903 = vmatpush1.bf16.msra.mxu1 %v5282_v41  ;;  %v5374_v40 = vld [vmem:[%s6003_s22 + $0xaa8] ss:$16 sps:$4 sm:$0xff]   ;;  %v5379_v41 = vld [vmem:[%s6003_s22 + $0xac4] ss:$16 sps:$4 sm:$0xff]  }
 0x18e   : > { %3576 = vmatprep.subr.bf16.mxu0 %v5287_v42  ;;  %3904 = vmatprep.subr.bf16.mxu1 %v5290_v43  ;;  %v5382_v42 = vld [vmem:[%s6003_s22 + $0xacc] ss:$16 sps:$4 sm:$0xff]   ;;  %v5377_v43 = vld [vmem:[%s6003_s22 + $0xac0] ss:$16 sps:$4 sm:$0xff]  }
 0x191   : > { %3577 = vmatpush1.bf16.msra.mxu0 %v5285_v44  ;;  %3905 = vmatpush1.bf16.msra.mxu1 %v5288_v45  ;;  %v5380_v44 = vld [vmem:[%s6003_s22 + $0xac8] ss:$16 sps:$4 sm:$0xff]   ;;  %v5385_v45 = vld [vmem:[%s6003_s22 + $0xae4] ss:$16 sps:$4 sm:$0xff]  }
 0x192   : > { %3578 = vmatprep.subr.bf16.mxu0 %v5293_v46  ;;  %3906 = vmatprep.subr.bf16.mxu1 %v5296_v47  ;;  %v5388_v46 = vld [vmem:[%s6003_s22 + $0xaec] ss:$16 sps:$4 sm:$0xff]   ;;  %v5383_v47 = vld [vmem:[%s6003_s22 + $0xae0] ss:$16 sps:$4 sm:$0xff]  }
 0x195   : > { %3579 = vmatpush1.bf16.msra.mxu0 %v5291_v48  ;;  %3907 = vmatpush1.bf16.msra.mxu1 %v5294_v49  ;;  %v5386_v48 = vld [vmem:[%s6003_s22 + $0xae8] ss:$16 sps:$4 sm:$0xff]   ;;  %v5391_v49 = vld [vmem:[%s6003_s22 + $0xb04] ss:$16 sps:$4 sm:$0xff]  }
 0x196   : > { %3580 = vmatprep.subr.bf16.mxu0 %v5299_v50  ;;  %3908 = vmatprep.subr.bf16.mxu1 %v5302_v51  ;;  %v5394_v50 = vld [vmem:[%s6003_s22 + $0xb0c] ss:$16 sps:$4 sm:$0xff]   ;;  %v5389_v51 = vld [vmem:[%s6003_s22 + $0xb00] ss:$16 sps:$4 sm:$0xff]  }
 0x199   : > { %3581 = vmatpush1.bf16.msra.mxu0 %v5297_v52  ;;  %3909 = vmatpush1.bf16.msra.mxu1 %v5300_v53  ;;  %v5392_v52 = vld [vmem:[%s6003_s22 + $0xb08] ss:$16 sps:$4 sm:$0xff]   ;;  %v5397_v53 = vld [vmem:[%s6003_s22 + $0xb24] ss:$16 sps:$4 sm:$0xff]  }
 0x19a   : > { %3582 = vmatprep.subr.bf16.mxu0 %v5305_v54  ;;  %3910 = vmatprep.subr.bf16.mxu1 %v5308_v55  ;;  %v5400_v54 = vld [vmem:[%s6003_s22 + $0xb2c] ss:$16 sps:$4 sm:$0xff]   ;;  %v5395_v55 = vld [vmem:[%s6003_s22 + $0xb20] ss:$16 sps:$4 sm:$0xff]  }
 0x19d   : > { %3583 = vmatpush1.bf16.msra.mxu0 %v5303_v56  ;;  %3911 = vmatpush1.bf16.msra.mxu1 %v5306_v57  ;;  %v5398_v56 = vld [vmem:[%s6003_s22 + $0xb28] ss:$16 sps:$4 sm:$0xff]   ;;  %v5403_v57 = vld [vmem:[%s6003_s22 + $0xb44] ss:$16 sps:$4 sm:$0xff]  }
 0x19e   : > { %3584 = vmatprep.subr.bf16.mxu0 %v5311_v58  ;;  %3912 = vmatprep.subr.bf16.mxu1 %v5314_v59  ;;  %v5406_v58 = vld [vmem:[%s6003_s22 + $0xb4c] ss:$16 sps:$4 sm:$0xff]   ;;  %v5401_v59 = vld [vmem:[%s6003_s22 + $0xb40] ss:$16 sps:$4 sm:$0xff]  }
 0x1a1   : > { %3585 = vmatpush1.bf16.msra.mxu0 %v5309_v60  ;;  %3913 = vmatpush1.bf16.msra.mxu1 %v5312_v61  ;;  %v5404_v60 = vld [vmem:[%s6003_s22 + $0xb48] ss:$16 sps:$4 sm:$0xff]   ;;  %v5409_v61 = vld [vmem:[%s6003_s22 + $0xb64] ss:$16 sps:$4 sm:$0xff]  }
 0x1a2   : > { %3586 = vmatprep.subr.bf16.mxu0 %v5317_v62  ;;  %3914 = vmatprep.subr.bf16.mxu1 %v5320_v63  ;;  %v5412_v62 = vld [vmem:[%s6003_s22 + $0xb6c] ss:$16 sps:$4 sm:$0xff]   ;;  %v5407_v63 = vld [vmem:[%s6003_s22 + $0xb60] ss:$16 sps:$4 sm:$0xff]  }
 0x1a5   : > { %3587 = vmatpush1.bf16.msra.mxu0 %v5315_v0  ;;  %3915 = vmatpush1.bf16.msra.mxu1 %v5318_v1  ;;  %v5410_v0 = vld [vmem:[%s6003_s22 + $0xb68] ss:$16 sps:$4 sm:$0xff]   ;;  %v5415_v1 = vld [vmem:[%s6003_s22 + $0xb84] ss:$16 sps:$4 sm:$0xff]  }
 0x1a6   : > { %3588 = vmatprep.subr.bf16.mxu0 %v5323_v2  ;;  %3916 = vmatprep.subr.bf16.mxu1 %v5326_v3  ;;  %v5418_v2 = vld [vmem:[%s6003_s22 + $0xb8c] ss:$16 sps:$4 sm:$0xff]   ;;  %v5413_v3 = vld [vmem:[%s6003_s22 + $0xb80] ss:$16 sps:$4 sm:$0xff]  }
 0x1a9   : > { %3589 = vmatpush1.bf16.msra.mxu0 %v5321_v4  ;;  %3917 = vmatpush1.bf16.msra.mxu1 %v5324_v5  ;;  %v5416_v4 = vld [vmem:[%s6003_s22 + $0xb88] ss:$16 sps:$4 sm:$0xff]   ;;  %v5421_v5 = vld [vmem:[%s6003_s22 + $0xba4] ss:$16 sps:$4 sm:$0xff]  }
 0x1aa   : > { %3590 = vmatprep.subr.bf16.mxu0 %v5329_v6  ;;  %3918 = vmatprep.subr.bf16.mxu1 %v5332_v7  ;;  %v5424_v6 = vld [vmem:[%s6003_s22 + $0xbac] ss:$16 sps:$4 sm:$0xff]   ;;  %v5419_v7 = vld [vmem:[%s6003_s22 + $0xba0] ss:$16 sps:$4 sm:$0xff]  }
 0x1ad   : > { %3591 = vmatpush1.bf16.msra.mxu0 %v5327_v8  ;;  %3919 = vmatpush1.bf16.msra.mxu1 %v5330_v9  ;;  %v5422_v8 = vld [vmem:[%s6003_s22 + $0xba8] ss:$16 sps:$4 sm:$0xff]   ;;  %v5427_v9 = vld [vmem:[%s6003_s22 + $0xbc4] ss:$16 sps:$4 sm:$0xff]  }
 0x1ae   : > { %3592 = vmatprep.subr.bf16.mxu0 %v5335_v10  ;;  %3920 = vmatprep.subr.bf16.mxu1 %v5338_v12  ;;  %v5430_v10 = vld [vmem:[%s6003_s22 + $0xbcc] ss:$16 sps:$4 sm:$0xff]   ;;  %v5425_v12 = vld [vmem:[%s6003_s22 + $0xbc0] ss:$16 sps:$4 sm:$0xff]  }
 0x1b1   : > { %3593 = vmatpush1.bf16.msra.mxu0 %v5333_v13  ;;  %3921 = vmatpush1.bf16.msra.mxu1 %v5336_v15  ;;  %v5428_v13 = vld [vmem:[%s6003_s22 + $0xbc8] ss:$16 sps:$4 sm:$0xff]   ;;  %v5433_v15 = vld [vmem:[%s6003_s22 + $0xbe4] ss:$16 sps:$4 sm:$0xff]  }
 0x1b2   : > { %3603 = vmatprep.subr.bf16.mxu0 %v5343_v16  ;;  %3931 = vmatprep.subr.bf16.mxu1 %v5346_v11  ;;  %v5436_v16 = vld [vmem:[%s6003_s22 + $0xbec] ss:$16 sps:$4 sm:$0xff]   ;;  %v5431_v11 = vld [vmem:[%s6003_s22 + $0xbe0] ss:$16 sps:$4 sm:$0xff]  }
 0x1b4   : > { %3595 = vmatmul.mubr.bf16.vlgmr.msra.gmra.mrb[0].mxu0 %v4198_v19  ;;  %3923 = vmatmul.mubr.bf16.vlgmr.msra.gmra.mrb[0].mxu1 %v4198_v19  ;;  %v5434_v19 = vld [vmem:[%s6003_s22 + $0xbe8] ss:$16 sps:$4 sm:$0xff]  }
 0x1b5   : > { %3604 = vmatpush1.bf16.msra.mxu0 %v5341_v20  ;;  %3932 = vmatpush1.bf16.msra.mxu1 %v5344_v14  ;;  %v5441_v20 = vld [vmem:[%s6003_s22 + $0xc04] ss:$16 sps:$4 sm:$0xff]   ;;  %v5444_v14 = vld [vmem:[%s6003_s22 + $0xc0c] ss:$16 sps:$4 sm:$0xff]  }
 0x1b6   : > { %3605 = vmatprep.subr.bf16.mxu0 %v5349_v21  ;;  %3933 = vmatprep.subr.bf16.mxu1 %v5352_v22  ;;  %v4200_v21 = vcombine.low %v6353_v18, %v6353_v18  ;;  %v6425_v22 = vld [vmem:[#allocation2 + $0x30] sm:$0xff] }
 0x1b7   : > { %3635 = vmatprep.mubr.bf16.mxu0 %v4201_v23  ;;  %3963 = vmatprep.mubr.bf16.mxu1 %v4201_v23  ;;  %v5439_v23 = vld [vmem:[%s6003_s22 + $0xc00] ss:$16 sps:$4 sm:$0xff]  }
 0x1b8   : > { %v5445_v18 = vld [vmem:[%s6003_s22 + $0xc20] ss:$16 sps:$4 sm:$0xff]  }
 0x1b9   : > { %3606 = vmatpush1.bf16.msra.mxu0 %v5347_v17  ;;  %3934 = vmatpush1.bf16.msra.mxu1 %v5350_v24  ;;  %v5442_v17 = vld [vmem:[%s6003_s22 + $0xc08] ss:$16 sps:$4 sm:$0xff]   ;;  %v5447_v24 = vld [vmem:[%s6003_s22 + $0xc24] ss:$16 sps:$4 sm:$0xff]  }
 0x1ba   : > { %3607 = vmatprep.subr.bf16.mxu0 %v5355_v25  ;;  %3935 = vmatprep.subr.bf16.mxu1 %v5358_v26  ;;  %v5450_v25 = vld [vmem:[%s6003_s22 + $0xc2c] ss:$16 sps:$4 sm:$0xff]   ;;  %v4203_v26 = vcombine.high %v6425_v22, %v6425_v22 }
 0x1bd   : > { %3608 = vmatpush1.bf16.msra.mxu0 %v5353_v27  ;;  %3936 = vmatpush1.bf16.msra.mxu1 %v5356_v28  ;;  %v5448_v27 = vld [vmem:[%s6003_s22 + $0xc28] ss:$16 sps:$4 sm:$0xff]   ;;  %v5453_v28 = vld [vmem:[%s6003_s22 + $0xc44] ss:$16 sps:$4 sm:$0xff]  }
 0x1be   : > { %3609 = vmatprep.subr.bf16.mxu0 %v5361_v29  ;;  %3937 = vmatprep.subr.bf16.mxu1 %v5364_v30  ;;  %v5456_v29 = vld [vmem:[%s6003_s22 + $0xc4c] ss:$16 sps:$4 sm:$0xff]   ;;  %v5451_v30 = vld [vmem:[%s6003_s22 + $0xc40] ss:$16 sps:$4 sm:$0xff]  }
 0x1c1   : > { %3610 = vmatpush1.bf16.msra.mxu0 %v5359_v31  ;;  %3938 = vmatpush1.bf16.msra.mxu1 %v5362_v32  ;;  %v5454_v31 = vld [vmem:[%s6003_s22 + $0xc48] ss:$16 sps:$4 sm:$0xff]   ;;  %v5459_v32 = vld [vmem:[%s6003_s22 + $0xc64] ss:$16 sps:$4 sm:$0xff]  }
 0x1c2   : > { %3611 = vmatprep.subr.bf16.mxu0 %v5367_v33  ;;  %3939 = vmatprep.subr.bf16.mxu1 %v5370_v34  ;;  %v5462_v33 = vld [vmem:[%s6003_s22 + $0xc6c] ss:$16 sps:$4 sm:$0xff]   ;;  %v5457_v34 = vld [vmem:[%s6003_s22 + $0xc60] ss:$16 sps:$4 sm:$0xff]  }
 0x1c5   : > { %3612 = vmatpush1.bf16.msra.mxu0 %v5365_v35  ;;  %3940 = vmatpush1.bf16.msra.mxu1 %v5368_v36  ;;  %v5460_v35 = vld [vmem:[%s6003_s22 + $0xc68] ss:$16 sps:$4 sm:$0xff]   ;;  %v5465_v36 = vld [vmem:[%s6003_s22 + $0xc84] ss:$16 sps:$4 sm:$0xff]  }
 0x1c6   : > { %3613 = vmatprep.subr.bf16.mxu0 %v5373_v37  ;;  %3941 = vmatprep.subr.bf16.mxu1 %v5376_v38  ;;  %v5468_v37 = vld [vmem:[%s6003_s22 + $0xc8c] ss:$16 sps:$4 sm:$0xff]   ;;  %v5463_v38 = vld [vmem:[%s6003_s22 + $0xc80] ss:$16 sps:$4 sm:$0xff]  }
 0x1c9   : > { %3614 = vmatpush1.bf16.msra.mxu0 %v5371_v39  ;;  %3942 = vmatpush1.bf16.msra.mxu1 %v5374_v40  ;;  %v5466_v39 = vld [vmem:[%s6003_s22 + $0xc88] ss:$16 sps:$4 sm:$0xff]   ;;  %v5471_v40 = vld [vmem:[%s6003_s22 + $0xca4] ss:$16 sps:$4 sm:$0xff]  }
 0x1ca   : > { %3615 = vmatprep.subr.bf16.mxu0 %v5379_v41  ;;  %3943 = vmatprep.subr.bf16.mxu1 %v5382_v42  ;;  %v5474_v41 = vld [vmem:[%s6003_s22 + $0xcac] ss:$16 sps:$4 sm:$0xff]   ;;  %v5469_v42 = vld [vmem:[%s6003_s22 + $0xca0] ss:$16 sps:$4 sm:$0xff]  }
 0x1cd   : > { %3616 = vmatpush1.bf16.msra.mxu0 %v5377_v43  ;;  %3944 = vmatpush1.bf16.msra.mxu1 %v5380_v44  ;;  %v5472_v43 = vld [vmem:[%s6003_s22 + $0xca8] ss:$16 sps:$4 sm:$0xff]   ;;  %v5477_v44 = vld [vmem:[%s6003_s22 + $0xcc4] ss:$16 sps:$4 sm:$0xff]  }
 0x1ce   : > { %3617 = vmatprep.subr.bf16.mxu0 %v5385_v45  ;;  %3945 = vmatprep.subr.bf16.mxu1 %v5388_v46  ;;  %v5480_v45 = vld [vmem:[%s6003_s22 + $0xccc] ss:$16 sps:$4 sm:$0xff]   ;;  %v5475_v46 = vld [vmem:[%s6003_s22 + $0xcc0] ss:$16 sps:$4 sm:$0xff]  }
 0x1d1   : > { %3618 = vmatpush1.bf16.msra.mxu0 %v5383_v47  ;;  %3946 = vmatpush1.bf16.msra.mxu1 %v5386_v48  ;;  %v5478_v47 = vld [vmem:[%s6003_s22 + $0xcc8] ss:$16 sps:$4 sm:$0xff]   ;;  %v5483_v48 = vld [vmem:[%s6003_s22 + $0xce4] ss:$16 sps:$4 sm:$0xff]  }
 0x1d2   : > { %3619 = vmatprep.subr.bf16.mxu0 %v5391_v49  ;;  %3947 = vmatprep.subr.bf16.mxu1 %v5394_v50  ;;  %v5486_v49 = vld [vmem:[%s6003_s22 + $0xcec] ss:$16 sps:$4 sm:$0xff]   ;;  %v5481_v50 = vld [vmem:[%s6003_s22 + $0xce0] ss:$16 sps:$4 sm:$0xff]  }
 0x1d5   : > { %3620 = vmatpush1.bf16.msra.mxu0 %v5389_v51  ;;  %3948 = vmatpush1.bf16.msra.mxu1 %v5392_v52  ;;  %v5484_v51 = vld [vmem:[%s6003_s22 + $0xce8] ss:$16 sps:$4 sm:$0xff]   ;;  %v5489_v52 = vld [vmem:[%s6003_s22 + $0xd04] ss:$16 sps:$4 sm:$0xff]  }
 0x1d6   : > { %3621 = vmatprep.subr.bf16.mxu0 %v5397_v53  ;;  %3949 = vmatprep.subr.bf16.mxu1 %v5400_v54  ;;  %v5492_v53 = vld [vmem:[%s6003_s22 + $0xd0c] ss:$16 sps:$4 sm:$0xff]   ;;  %v5487_v54 = vld [vmem:[%s6003_s22 + $0xd00] ss:$16 sps:$4 sm:$0xff]  }
 0x1d9   : > { %3622 = vmatpush1.bf16.msra.mxu0 %v5395_v55  ;;  %3950 = vmatpush1.bf16.msra.mxu1 %v5398_v56  ;;  %v5490_v55 = vld [vmem:[%s6003_s22 + $0xd08] ss:$16 sps:$4 sm:$0xff]   ;;  %v5495_v56 = vld [vmem:[%s6003_s22 + $0xd24] ss:$16 sps:$4 sm:$0xff]  }
 0x1da   : > { %3623 = vmatprep.subr.bf16.mxu0 %v5403_v57  ;;  %3951 = vmatprep.subr.bf16.mxu1 %v5406_v58  ;;  %v5498_v57 = vld [vmem:[%s6003_s22 + $0xd2c] ss:$16 sps:$4 sm:$0xff]   ;;  %v5493_v58 = vld [vmem:[%s6003_s22 + $0xd20] ss:$16 sps:$4 sm:$0xff]  }
 0x1dd   : > { %3624 = vmatpush1.bf16.msra.mxu0 %v5401_v59  ;;  %3952 = vmatpush1.bf16.msra.mxu1 %v5404_v60  ;;  %v5496_v59 = vld [vmem:[%s6003_s22 + $0xd28] ss:$16 sps:$4 sm:$0xff]   ;;  %v5501_v60 = vld [vmem:[%s6003_s22 + $0xd44] ss:$16 sps:$4 sm:$0xff]  }
 0x1de   : > { %3625 = vmatprep.subr.bf16.mxu0 %v5409_v61  ;;  %3953 = vmatprep.subr.bf16.mxu1 %v5412_v62  ;;  %v5504_v61 = vld [vmem:[%s6003_s22 + $0xd4c] ss:$16 sps:$4 sm:$0xff]   ;;  %v5499_v62 = vld [vmem:[%s6003_s22 + $0xd40] ss:$16 sps:$4 sm:$0xff]  }
 0x1e1   : > { %3626 = vmatpush1.bf16.msra.mxu0 %v5407_v63  ;;  %3954 = vmatpush1.bf16.msra.mxu1 %v5410_v0  ;;  %v5502_v63 = vld [vmem:[%s6003_s22 + $0xd48] ss:$16 sps:$4 sm:$0xff]   ;;  %v5507_v0 = vld [vmem:[%s6003_s22 + $0xd64] ss:$16 sps:$4 sm:$0xff]  }
 0x1e2   : > { %3627 = vmatprep.subr.bf16.mxu0 %v5415_v1  ;;  %3955 = vmatprep.subr.bf16.mxu1 %v5418_v2  ;;  %v5510_v1 = vld [vmem:[%s6003_s22 + $0xd6c] ss:$16 sps:$4 sm:$0xff]   ;;  %v5505_v2 = vld [vmem:[%s6003_s22 + $0xd60] ss:$16 sps:$4 sm:$0xff]  }
 0x1e5   : > { %3628 = vmatpush1.bf16.msra.mxu0 %v5413_v3  ;;  %3956 = vmatpush1.bf16.msra.mxu1 %v5416_v4  ;;  %v5508_v3 = vld [vmem:[%s6003_s22 + $0xd68] ss:$16 sps:$4 sm:$0xff]   ;;  %v5513_v4 = vld [vmem:[%s6003_s22 + $0xd84] ss:$16 sps:$4 sm:$0xff]  }
 0x1e6   : > { %3629 = vmatprep.subr.bf16.mxu0 %v5421_v5  ;;  %3957 = vmatprep.subr.bf16.mxu1 %v5424_v6  ;;  %v5516_v5 = vld [vmem:[%s6003_s22 + $0xd8c] ss:$16 sps:$4 sm:$0xff]   ;;  %v5511_v6 = vld [vmem:[%s6003_s22 + $0xd80] ss:$16 sps:$4 sm:$0xff]  }
 0x1e9   : > { %3630 = vmatpush1.bf16.msra.mxu0 %v5419_v7  ;;  %3958 = vmatpush1.bf16.msra.mxu1 %v5422_v8  ;;  %v5514_v7 = vld [vmem:[%s6003_s22 + $0xd88] ss:$16 sps:$4 sm:$0xff]   ;;  %v5519_v8 = vld [vmem:[%s6003_s22 + $0xda4] ss:$16 sps:$4 sm:$0xff]  }
 0x1ea   : > { %3631 = vmatprep.subr.bf16.mxu0 %v5427_v9  ;;  %3959 = vmatprep.subr.bf16.mxu1 %v5430_v10  ;;  %v5522_v9 = vld [vmem:[%s6003_s22 + $0xdac] ss:$16 sps:$4 sm:$0xff]   ;;  %v5517_v10 = vld [vmem:[%s6003_s22 + $0xda0] ss:$16 sps:$4 sm:$0xff]  }
 0x1ed   : > { %3632 = vmatpush1.bf16.msra.mxu0 %v5425_v12  ;;  %3960 = vmatpush1.bf16.msra.mxu1 %v5428_v13  ;;  %v5520_v12 = vld [vmem:[%s6003_s22 + $0xda8] ss:$16 sps:$4 sm:$0xff]   ;;  %v5525_v13 = vld [vmem:[%s6003_s22 + $0xdc4] ss:$16 sps:$4 sm:$0xff]  }
 0x1ee   : > { %3633 = vmatprep.subr.bf16.mxu0 %v5433_v15  ;;  %3961 = vmatprep.subr.bf16.mxu1 %v5436_v16  ;;  %v5528_v15 = vld [vmem:[%s6003_s22 + $0xdcc] ss:$16 sps:$4 sm:$0xff]   ;;  %v5523_v16 = vld [vmem:[%s6003_s22 + $0xdc0] ss:$16 sps:$4 sm:$0xff]  }
 0x1f1   : > { %3634 = vmatpush1.bf16.msra.mxu0 %v5431_v11  ;;  %3962 = vmatpush1.bf16.msra.mxu1 %v5434_v19  ;;  %v5526_v11 = vld [vmem:[%s6003_s22 + $0xdc8] ss:$16 sps:$4 sm:$0xff]   ;;  %v5531_v19 = vld [vmem:[%s6003_s22 + $0xde4] ss:$16 sps:$4 sm:$0xff]  }
 0x1f2   : > { %3644 = vmatprep.subr.bf16.mxu0 %v5441_v20  ;;  %3972 = vmatprep.subr.bf16.mxu1 %v5444_v14  ;;  %v5534_v20 = vld [vmem:[%s6003_s22 + $0xdec] ss:$16 sps:$4 sm:$0xff]   ;;  %v5529_v14 = vld [vmem:[%s6003_s22 + $0xde0] ss:$16 sps:$4 sm:$0xff]  }
 0x1f4   : > { %3636 = vmatmul.mubr.bf16.vlgmr.msra.gmra.mrb[0].mxu0 %v4200_v21  ;;  %3964 = vmatmul.mubr.bf16.vlgmr.msra.gmra.mrb[0].mxu1 %v4200_v21  ;;  %v5532_v21 = vld [vmem:[%s6003_s22 + $0xde8] ss:$16 sps:$4 sm:$0xff]  }
 0x1f5   : > { %3645 = vmatpush1.bf16.msra.mxu0 %v5439_v23  ;;  %3973 = vmatpush1.bf16.msra.mxu1 %v5442_v17  ;;  %v5539_v23 = vld [vmem:[%s6003_s22 + $0xe04] ss:$16 sps:$4 sm:$0xff]   ;;  %v5542_v17 = vld [vmem:[%s6003_s22 + $0xe0c] ss:$16 sps:$4 sm:$0xff]  }
 0x1f6   : > { %3646 = vmatprep.subr.bf16.mxu0 %v5447_v24  ;;  %3974 = vmatprep.subr.bf16.mxu1 %v5450_v25  ;;  %v4202_v24 = vcombine.low %v6425_v22, %v6425_v22  ;;  %v6495_v25 = vld [vmem:[#allocation2 + $0x38] sm:$0xff]  ;;  %v5543_v22 = vld [vmem:[%s6003_s22 + $0xe20] ss:$16 sps:$4 sm:$0xff]  }
 0x1f7   : > { %3676 = vmatprep.mubr.bf16.mxu0 %v4203_v26  ;;  %4004 = vmatprep.mubr.bf16.mxu1 %v4203_v26  ;;  %v5537_v26 = vld [vmem:[%s6003_s22 + $0xe00] ss:$16 sps:$4 sm:$0xff]  }
 0x1f9   : > { %3647 = vmatpush1.bf16.msra.mxu0 %v5445_v18  ;;  %3975 = vmatpush1.bf16.msra.mxu1 %v5448_v27  ;;  %v5540_v18 = vld [vmem:[%s6003_s22 + $0xe08] ss:$16 sps:$4 sm:$0xff]   ;;  %v5545_v27 = vld [vmem:[%s6003_s22 + $0xe24] ss:$16 sps:$4 sm:$0xff]  }
 0x1fa   : > { %3648 = vmatprep.subr.bf16.mxu0 %v5453_v28  ;;  %3976 = vmatprep.subr.bf16.mxu1 %v5456_v29  ;;  %v5548_v28 = vld [vmem:[%s6003_s22 + $0xe2c] ss:$16 sps:$4 sm:$0xff]   ;;  %v4205_v29 = vcombine.high %v6495_v25, %v6495_v25 }
 0x1fd   : > { %3649 = vmatpush1.bf16.msra.mxu0 %v5451_v30  ;;  %3977 = vmatpush1.bf16.msra.mxu1 %v5454_v31  ;;  %v5546_v30 = vld [vmem:[%s6003_s22 + $0xe28] ss:$16 sps:$4 sm:$0xff]   ;;  %v5551_v31 = vld [vmem:[%s6003_s22 + $0xe44] ss:$16 sps:$4 sm:$0xff]  }
 0x1fe   : > { %3650 = vmatprep.subr.bf16.mxu0 %v5459_v32  ;;  %3978 = vmatprep.subr.bf16.mxu1 %v5462_v33  ;;  %v5554_v32 = vld [vmem:[%s6003_s22 + $0xe4c] ss:$16 sps:$4 sm:$0xff]   ;;  %v5549_v33 = vld [vmem:[%s6003_s22 + $0xe40] ss:$16 sps:$4 sm:$0xff]  }
 0x201   : > { %3651 = vmatpush1.bf16.msra.mxu0 %v5457_v34  ;;  %3979 = vmatpush1.bf16.msra.mxu1 %v5460_v35  ;;  %v5552_v34 = vld [vmem:[%s6003_s22 + $0xe48] ss:$16 sps:$4 sm:$0xff]   ;;  %v5557_v35 = vld [vmem:[%s6003_s22 + $0xe64] ss:$16 sps:$4 sm:$0xff]  }
 0x202   : > { %3652 = vmatprep.subr.bf16.mxu0 %v5465_v36  ;;  %3980 = vmatprep.subr.bf16.mxu1 %v5468_v37  ;;  %v5560_v36 = vld [vmem:[%s6003_s22 + $0xe6c] ss:$16 sps:$4 sm:$0xff]   ;;  %v5555_v37 = vld [vmem:[%s6003_s22 + $0xe60] ss:$16 sps:$4 sm:$0xff]  }
 0x205   : > { %3653 = vmatpush1.bf16.msra.mxu0 %v5463_v38  ;;  %3981 = vmatpush1.bf16.msra.mxu1 %v5466_v39  ;;  %v5558_v38 = vld [vmem:[%s6003_s22 + $0xe68] ss:$16 sps:$4 sm:$0xff]   ;;  %v5563_v39 = vld [vmem:[%s6003_s22 + $0xe84] ss:$16 sps:$4 sm:$0xff]  }
 0x206   : > { %3654 = vmatprep.subr.bf16.mxu0 %v5471_v40  ;;  %3982 = vmatprep.subr.bf16.mxu1 %v5474_v41  ;;  %v5566_v40 = vld [vmem:[%s6003_s22 + $0xe8c] ss:$16 sps:$4 sm:$0xff]   ;;  %v5561_v41 = vld [vmem:[%s6003_s22 + $0xe80] ss:$16 sps:$4 sm:$0xff]  }
 0x209   : > { %3655 = vmatpush1.bf16.msra.mxu0 %v5469_v42  ;;  %3983 = vmatpush1.bf16.msra.mxu1 %v5472_v43  ;;  %v5564_v42 = vld [vmem:[%s6003_s22 + $0xe88] ss:$16 sps:$4 sm:$0xff]   ;;  %v5569_v43 = vld [vmem:[%s6003_s22 + $0xea4] ss:$16 sps:$4 sm:$0xff]  }
 0x20a   : > { %3656 = vmatprep.subr.bf16.mxu0 %v5477_v44  ;;  %3984 = vmatprep.subr.bf16.mxu1 %v5480_v45  ;;  %v5572_v44 = vld [vmem:[%s6003_s22 + $0xeac] ss:$16 sps:$4 sm:$0xff]   ;;  %v5567_v45 = vld [vmem:[%s6003_s22 + $0xea0] ss:$16 sps:$4 sm:$0xff]  }
 0x20d   : > { %3657 = vmatpush1.bf16.msra.mxu0 %v5475_v46  ;;  %3985 = vmatpush1.bf16.msra.mxu1 %v5478_v47  ;;  %v5570_v46 = vld [vmem:[%s6003_s22 + $0xea8] ss:$16 sps:$4 sm:$0xff]   ;;  %v5575_v47 = vld [vmem:[%s6003_s22 + $0xec4] ss:$16 sps:$4 sm:$0xff]  }
 0x20e   : > { %3658 = vmatprep.subr.bf16.mxu0 %v5483_v48  ;;  %3986 = vmatprep.subr.bf16.mxu1 %v5486_v49  ;;  %v5578_v48 = vld [vmem:[%s6003_s22 + $0xecc] ss:$16 sps:$4 sm:$0xff]   ;;  %v5573_v49 = vld [vmem:[%s6003_s22 + $0xec0] ss:$16 sps:$4 sm:$0xff]  }
 0x211   : > { %3659 = vmatpush1.bf16.msra.mxu0 %v5481_v50  ;;  %3987 = vmatpush1.bf16.msra.mxu1 %v5484_v51  ;;  %v5576_v50 = vld [vmem:[%s6003_s22 + $0xec8] ss:$16 sps:$4 sm:$0xff]   ;;  %v5581_v51 = vld [vmem:[%s6003_s22 + $0xee4] ss:$16 sps:$4 sm:$0xff]  }
 0x212   : > { %3660 = vmatprep.subr.bf16.mxu0 %v5489_v52  ;;  %3988 = vmatprep.subr.bf16.mxu1 %v5492_v53  ;;  %v5584_v52 = vld [vmem:[%s6003_s22 + $0xeec] ss:$16 sps:$4 sm:$0xff]   ;;  %v5579_v53 = vld [vmem:[%s6003_s22 + $0xee0] ss:$16 sps:$4 sm:$0xff]  }
 0x215   : > { %3661 = vmatpush1.bf16.msra.mxu0 %v5487_v54  ;;  %3989 = vmatpush1.bf16.msra.mxu1 %v5490_v55  ;;  %v5582_v54 = vld [vmem:[%s6003_s22 + $0xee8] ss:$16 sps:$4 sm:$0xff]   ;;  %v5587_v55 = vld [vmem:[%s6003_s22 + $0xf04] ss:$16 sps:$4 sm:$0xff]  }
 0x216   : > { %3662 = vmatprep.subr.bf16.mxu0 %v5495_v56  ;;  %3990 = vmatprep.subr.bf16.mxu1 %v5498_v57  ;;  %v5590_v56 = vld [vmem:[%s6003_s22 + $0xf0c] ss:$16 sps:$4 sm:$0xff]   ;;  %v5585_v57 = vld [vmem:[%s6003_s22 + $0xf00] ss:$16 sps:$4 sm:$0xff]  }
 0x219   : > { %3663 = vmatpush1.bf16.msra.mxu0 %v5493_v58  ;;  %3991 = vmatpush1.bf16.msra.mxu1 %v5496_v59  ;;  %v5588_v58 = vld [vmem:[%s6003_s22 + $0xf08] ss:$16 sps:$4 sm:$0xff]   ;;  %v5593_v59 = vld [vmem:[%s6003_s22 + $0xf24] ss:$16 sps:$4 sm:$0xff]  }
 0x21a   : > { %3664 = vmatprep.subr.bf16.mxu0 %v5501_v60  ;;  %3992 = vmatprep.subr.bf16.mxu1 %v5504_v61  ;;  %v5596_v60 = vld [vmem:[%s6003_s22 + $0xf2c] ss:$16 sps:$4 sm:$0xff]   ;;  %v5591_v61 = vld [vmem:[%s6003_s22 + $0xf20] ss:$16 sps:$4 sm:$0xff]  }
 0x21d   : > { %3665 = vmatpush1.bf16.msra.mxu0 %v5499_v62  ;;  %3993 = vmatpush1.bf16.msra.mxu1 %v5502_v63  ;;  %v5594_v62 = vld [vmem:[%s6003_s22 + $0xf28] ss:$16 sps:$4 sm:$0xff]   ;;  %v5599_v63 = vld [vmem:[%s6003_s22 + $0xf44] ss:$16 sps:$4 sm:$0xff]  }
 0x21e   : > { %3666 = vmatprep.subr.bf16.mxu0 %v5507_v0  ;;  %3994 = vmatprep.subr.bf16.mxu1 %v5510_v1  ;;  %v5602_v0 = vld [vmem:[%s6003_s22 + $0xf4c] ss:$16 sps:$4 sm:$0xff]   ;;  %v5597_v1 = vld [vmem:[%s6003_s22 + $0xf40] ss:$16 sps:$4 sm:$0xff]  }
 0x221   : > { %3667 = vmatpush1.bf16.msra.mxu0 %v5505_v2  ;;  %3995 = vmatpush1.bf16.msra.mxu1 %v5508_v3  ;;  %v5600_v2 = vld [vmem:[%s6003_s22 + $0xf48] ss:$16 sps:$4 sm:$0xff]   ;;  %v5605_v3 = vld [vmem:[%s6003_s22 + $0xf64] ss:$16 sps:$4 sm:$0xff]  }
 0x222   : > { %3668 = vmatprep.subr.bf16.mxu0 %v5513_v4  ;;  %3996 = vmatprep.subr.bf16.mxu1 %v5516_v5  ;;  %v5608_v4 = vld [vmem:[%s6003_s22 + $0xf6c] ss:$16 sps:$4 sm:$0xff]   ;;  %v5603_v5 = vld [vmem:[%s6003_s22 + $0xf60] ss:$16 sps:$4 sm:$0xff]  }
 0x225   : > { %3669 = vmatpush1.bf16.msra.mxu0 %v5511_v6  ;;  %3997 = vmatpush1.bf16.msra.mxu1 %v5514_v7  ;;  %v5606_v6 = vld [vmem:[%s6003_s22 + $0xf68] ss:$16 sps:$4 sm:$0xff]   ;;  %v5611_v7 = vld [vmem:[%s6003_s22 + $0xf84] ss:$16 sps:$4 sm:$0xff]  }
 0x226   : > { %3670 = vmatprep.subr.bf16.mxu0 %v5519_v8  ;;  %3998 = vmatprep.subr.bf16.mxu1 %v5522_v9  ;;  %v5614_v8 = vld [vmem:[%s6003_s22 + $0xf8c] ss:$16 sps:$4 sm:$0xff]   ;;  %v5609_v9 = vld [vmem:[%s6003_s22 + $0xf80] ss:$16 sps:$4 sm:$0xff]  }
 0x229   : > { %3671 = vmatpush1.bf16.msra.mxu0 %v5517_v10  ;;  %3999 = vmatpush1.bf16.msra.mxu1 %v5520_v12  ;;  %v5612_v10 = vld [vmem:[%s6003_s22 + $0xf88] ss:$16 sps:$4 sm:$0xff]   ;;  %v5617_v12 = vld [vmem:[%s6003_s22 + $0xfa4] ss:$16 sps:$4 sm:$0xff]  }
 0x22a   : > { %3672 = vmatprep.subr.bf16.mxu0 %v5525_v13  ;;  %4000 = vmatprep.subr.bf16.mxu1 %v5528_v15  ;;  %v5620_v13 = vld [vmem:[%s6003_s22 + $0xfac] ss:$16 sps:$4 sm:$0xff]   ;;  %v5615_v15 = vld [vmem:[%s6003_s22 + $0xfa0] ss:$16 sps:$4 sm:$0xff]  }
 0x22d   : > { %3673 = vmatpush1.bf16.msra.mxu0 %v5523_v16  ;;  %4001 = vmatpush1.bf16.msra.mxu1 %v5526_v11  ;;  %v5618_v16 = vld [vmem:[%s6003_s22 + $0xfa8] ss:$16 sps:$4 sm:$0xff]   ;;  %v5623_v11 = vld [vmem:[%s6003_s22 + $0xfc4] ss:$16 sps:$4 sm:$0xff]  }
 0x22e   : > { %3674 = vmatprep.subr.bf16.mxu0 %v5531_v19  ;;  %4002 = vmatprep.subr.bf16.mxu1 %v5534_v20  ;;  %v5626_v19 = vld [vmem:[%s6003_s22 + $0xfcc] ss:$16 sps:$4 sm:$0xff]   ;;  %v5621_v20 = vld [vmem:[%s6003_s22 + $0xfc0] ss:$16 sps:$4 sm:$0xff]  }
 0x231   : > { %3675 = vmatpush1.bf16.msra.mxu0 %v5529_v14  ;;  %4003 = vmatpush1.bf16.msra.mxu1 %v5532_v21  ;;  %v5624_v14 = vld [vmem:[%s6003_s22 + $0xfc8] ss:$16 sps:$4 sm:$0xff]   ;;  %v5629_v21 = vld [vmem:[%s6003_s22 + $0xfe4] ss:$16 sps:$4 sm:$0xff]  }
 0x232   : > { %3685 = vmatprep.subr.bf16.mxu0 %v5539_v23  ;;  %4013 = vmatprep.subr.bf16.mxu1 %v5542_v17  ;;  %v5632_v23 = vld [vmem:[%s6003_s22 + $0xfec] ss:$16 sps:$4 sm:$0xff]   ;;  %v5627_v17 = vld [vmem:[%s6003_s22 + $0xfe0] ss:$16 sps:$4 sm:$0xff]  }
 0x234   : > { %3677 = vmatmul.mubr.bf16.vlgmr.msra.gmra.mrb[0].mxu0 %v4202_v24  ;;  %4005 = vmatmul.mubr.bf16.vlgmr.msra.gmra.mrb[0].mxu1 %v4202_v24  ;;  %v5630_v24 = vld [vmem:[%s6003_s22 + $0xfe8] ss:$16 sps:$4 sm:$0xff]  }
 0x235   : > { %3686 = vmatpush1.bf16.msra.mxu0 %v5537_v26  ;;  %4014 = vmatpush1.bf16.msra.mxu1 %v5540_v18  ;;  %v4204_v26 = vcombine.low %v6495_v25, %v6495_v25  ;;  %v762_v18 = vlaneseq }
 0x236   : > { %3687 = vmatprep.subr.bf16.mxu0 %v5545_v27  ;;  %4015 = vmatprep.subr.bf16.mxu1 %v5548_v28 }
 0x237   : > { %3717 = vmatprep.mubr.bf16.mxu0 %v4205_v29  ;;  %4045 = vmatprep.mubr.bf16.mxu1 %v4205_v29  ;;  %v763_v27 = vshrl.u32 %v762_v18, 7 }
 0x239   : > { %3688 = vmatpush1.bf16.msra.mxu0 %v5543_v22  ;;  %4016 = vmatpush1.bf16.msra.mxu1 %v5546_v30  ;;  %v764_v28 = vsub.s32 0, %v763_v27  ;;  %v772_v29 = vsub.s32 2, %v763_v27  ;;  %v760_v22 = vld [vmem:[%s209_s4] sm:$0xf]  ;;  %v768_v30 = vsub.s32 1, %v763_v27 }
 0x23a   : > { %3689 = vmatprep.subr.bf16.mxu0 %v5551_v31  ;;  %4017 = vmatprep.subr.bf16.mxu1 %v5554_v32  ;;  %v776_v31 = vsub.s32 3, %v763_v27 }
 0x23b   : > { %v765_v32 = vrot.slane %v760_v22, %v764_v28 }
 0x23d   : > { %3690 = vmatpush1.bf16.msra.mxu0 %v5549_v33  ;;  %4018 = vmatpush1.bf16.msra.mxu1 %v5552_v34  ;;  %v773_v33 = vrot.slane %v760_v22, %v772_v29  ;;  %v769_v34 = vrot.slane %v760_v22, %v768_v30 }
 0x23e   : > { %3691 = vmatprep.subr.bf16.mxu0 %v5557_v35  ;;  %4019 = vmatprep.subr.bf16.mxu1 %v5560_v36  ;;  %v777_v35 = vrot.slane %v760_v22, %v776_v31 }
 0x241   : > { %3692 = vmatpush1.bf16.msra.mxu0 %v5555_v37  ;;  %4020 = vmatpush1.bf16.msra.mxu1 %v5558_v38 }
 0x242   : > { %3693 = vmatprep.subr.bf16.mxu0 %v5563_v39  ;;  %4021 = vmatprep.subr.bf16.mxu1 %v5566_v40 }
 0x245   : > { %3694 = vmatpush1.bf16.msra.mxu0 %v5561_v41  ;;  %4022 = vmatpush1.bf16.msra.mxu1 %v5564_v42 }
 0x246   : > { %3695 = vmatprep.subr.bf16.mxu0 %v5569_v43  ;;  %4023 = vmatprep.subr.bf16.mxu1 %v5572_v44 }
 0x249   : > { %3696 = vmatpush1.bf16.msra.mxu0 %v5567_v45  ;;  %4024 = vmatpush1.bf16.msra.mxu1 %v5570_v46 }
 0x24a   : > { %3697 = vmatprep.subr.bf16.mxu0 %v5575_v47  ;;  %4025 = vmatprep.subr.bf16.mxu1 %v5578_v48 }
 0x24d   : > { %3698 = vmatpush1.bf16.msra.mxu0 %v5573_v49  ;;  %4026 = vmatpush1.bf16.msra.mxu1 %v5576_v50 }
 0x24e   : > { %3699 = vmatprep.subr.bf16.mxu0 %v5581_v51  ;;  %4027 = vmatprep.subr.bf16.mxu1 %v5584_v52 }
 0x251   : > { %3700 = vmatpush1.bf16.msra.mxu0 %v5579_v53  ;;  %4028 = vmatpush1.bf16.msra.mxu1 %v5582_v54 }
 0x252   : > { %3701 = vmatprep.subr.bf16.mxu0 %v5587_v55  ;;  %4029 = vmatprep.subr.bf16.mxu1 %v5590_v56 }
 0x255   : > { %3702 = vmatpush1.bf16.msra.mxu0 %v5585_v57  ;;  %4030 = vmatpush1.bf16.msra.mxu1 %v5588_v58 }
 0x256   : > { %3703 = vmatprep.subr.bf16.mxu0 %v5593_v59  ;;  %4031 = vmatprep.subr.bf16.mxu1 %v5596_v60 }
 0x259   : > { %3704 = vmatpush1.bf16.msra.mxu0 %v5591_v61  ;;  %4032 = vmatpush1.bf16.msra.mxu1 %v5594_v62 }
 0x25a   : > { %3705 = vmatprep.subr.bf16.mxu0 %v5599_v63  ;;  %4033 = vmatprep.subr.bf16.mxu1 %v5602_v0 }
 0x25d   : > { %3706 = vmatpush1.bf16.msra.mxu0 %v5597_v1  ;;  %4034 = vmatpush1.bf16.msra.mxu1 %v5600_v2 }
 0x25e   : > { %3707 = vmatprep.subr.bf16.mxu0 %v5605_v3  ;;  %4035 = vmatprep.subr.bf16.mxu1 %v5608_v4 }
 0x261   : > { %3708 = vmatpush1.bf16.msra.mxu0 %v5603_v5  ;;  %4036 = vmatpush1.bf16.msra.mxu1 %v5606_v6 }
 0x262   : > { %3709 = vmatprep.subr.bf16.mxu0 %v5611_v7  ;;  %4037 = vmatprep.subr.bf16.mxu1 %v5614_v8 }
 0x265   : > { %3710 = vmatpush1.bf16.msra.mxu0 %v5609_v9  ;;  %4038 = vmatpush1.bf16.msra.mxu1 %v5612_v10 }
 0x266   : > { %3711 = vmatprep.subr.bf16.mxu0 %v5617_v12  ;;  %4039 = vmatprep.subr.bf16.mxu1 %v5620_v13 }
 0x269   : > { %3712 = vmatpush1.bf16.msra.mxu0 %v5615_v15  ;;  %4040 = vmatpush1.bf16.msra.mxu1 %v5618_v16 }
 0x26a   : > { %3713 = vmatprep.subr.bf16.mxu0 %v5623_v11  ;;  %4041 = vmatprep.subr.bf16.mxu1 %v5626_v19 }
 0x26d   : > { %3714 = vmatpush1.bf16.msra.mxu0 %v5621_v20  ;;  %4042 = vmatpush1.bf16.msra.mxu1 %v5624_v14 }
 0x26e   : > { %3715 = vmatprep.subr.bf16.mxu0 %v5629_v21  ;;  %4043 = vmatprep.subr.bf16.mxu1 %v5632_v23 }
 0x271   : > { %3716 = vmatpush1.bf16.msra.mxu0 %v5627_v17  ;;  %4044 = vmatpush1.bf16.msra.mxu1 %v5630_v24 }
 0x274   : > { %3718 = vmatmul.mubr.bf16.vlgmr.msra.gmra.mrb[0].mxu0 %v4204_v26  ;;  %4046 = vmatmul.mubr.bf16.vlgmr.msra.gmra.mrb[0].mxu1 %v4204_v26 }
 0x347   : > { %v3719_v25 = vpop.f32.mrb[0].mxu0  ;;  %v4047_v36 = vpop.f32.mrb[0].mxu1 }
 0x348   : > { %v4726_v37 = vadd.f32 %v3719_v25, %v765_v32  ;;  %v4728_v38 = vadd.f32 %v4047_v36, %v773_v33  ;;  %v3721_v39 = vpop.f32.mrb[1].mxu0  ;;  %v4049_v40 = vpop.f32.mrb[1].mxu1 }
 0x349   : > { %v4727_v41 = vadd.f32 %v3721_v39, %v769_v34  ;;  %v4729_v42 = vadd.f32 %v4049_v40, %v777_v35  ;;  %v3723_v43 = vpop.f32.mrb[2].mxu0  ;;  %v4051_v44 = vpop.f32.mrb[2].mxu1 }
 0x34a   : > { %4054 = vst [vmem:[%s236_s20] sm:$0xff] %v4726_v37  ;;  %4056 = vst [vmem:[%s236_s20 + $0x10] sm:$0xff] %v4728_v38  ;;  %v3724_v45 = vpop.f32.mrb[3].mxu0  ;;  %v4052_v46 = vpop.f32.mrb[3].mxu1 }
 0x34b   : > { %4055 = vst [vmem:[%s236_s20 + $0x8] sm:$0xff] %v4727_v41  ;;  %4057 = vst [vmem:[%s236_s20 + $0x18] sm:$0xff] %v4729_v42 }
 0x34c   : > { %5736 = shalt.err (!%p5733_p1)
}
 0x34d   : > { %s5737_s17 = scalar_lea.hbm %s6569_s5, 512  ;;  %s5741_s21 = scalar_lea.hbm %s6616_s3, 1024 }
 0x34e   : > { %p5738_p6 = scmp.ne.s32.totalorder %s6569_s5, %s5737_s17  ;;  %p5742_p7 = scmp.lt.u32.totalorder %s6569_s5, %s6616_s3 }
 0x34f   : > { %p5743_p9 = scmp.lt.u32.totalorder %s5741_s21, %s5737_s17  ;;  %p5745_p12 = scmp.lt.u32.totalorder %s5737_s17, %s6569_s5 }
 0x350   : > { %p5739_p5 = pnand %p5738_p6, %p6637_p4 }
 0x351   : > { %p5744_p10 = por %p5743_p9, %p5742_p7 }
 0x352   : > { %p5740_p2 = pneg %p5739_p5 }
 0x353   : > { %p5746_p0 = por %p5745_p12, %p5744_p10 }
 0x355   : > { %p5747_p11 = pnand %p5746_p0, %p5740_p2 }
 0x357   : > { %5750 = shalt.err (!%p5747_p11)
}
 0x358   : > { %4794 = dma.vmem_to_hbm [thread:$0]  (%p6637_p4), %s6571_s23, 512, %s6569_s5, %s4059_s24  }
 0x359 PF: > { %s4085_s27 = sand.u32 1, %s5781_s12   ;;  %p6638_p13 = scmp.ne.s32.totalorder %s6627_s28, 0 }
 0x35a   : > { %p6639_p3 = scmp.ge.s32.totalorder %s5793_s15, 2  ;;  %s4086_s4 = scalar_lea.sflag [#allocation4], %s4085_s27 }
 0x35c   : > { %p4808_p8 = pnand %p6639_p3, %p6638_p13 }
 0x35e   : > { %5776 = dma.done.wait (!%p4808_p8), %s4086_s4, 512  }
 0x35f   : > { %5778 = vsyncadd (!%p4808_p8), %s4086_s4, 4294966784  ;;  %p17_p1 = scmp.ge.s32.totalorder %s5843_s16, 4   ;;  %s6640_s12 = smov %s5785_s13 }
 0x360   : > { %s6641_s13 = smov %s5789_s14  ;;  %s6642_s14 = smov %s5854_s19 }
 0x361   : > { %s6643_s15 = smov %s5843_s16  ;;  %19 = sbr.rel (!%p17_p1) target bundleno = 6 (0x6), region = 93 }
 0x368   :  { %4091 = vsyncpa [#allocation3], 1 }
 0x369   :  { %4093 = vsyncpa [#allocation3 + $0x1], 1 }
 0x36a   :  { %4094 = vsyncpa [#allocation6], 1 }
 0x36b   :  { %4096 = vsyncpa [#allocation6 + $0x1], 1 }
 0x36c   :  { %4097 = vsyncpa [#allocation4], 1 }
 0x36d   :  { %4099 = vsyncpa [#allocation4 + $0x1], 1 }

</bundles_post_ra>
